<compile_context>
chip_gen: v6e
topology: v6e:2x2x1
jax: 0.10.0
libtpu: 0.0.40
codegen_flags: <defaults>
</compile_context>

<pallas_src>
import jax
import jax.numpy as jnp
from jax import lax
from jax.experimental import pallas as pl
from jax.experimental.pallas import tpu as pltpu


def _make_cnn_kernel(*, K_max, NB, W, D, TV, C_pad, out_pad):
    """Fused embedding -> merged Conv1d -> ReLU -> maxpool -> fc -> ReLU -> mask."""
    RB = NB * W  # token rows per block

    def kernel(tok_ref, umask_ref, emb_ref, wstack_ref, cbias_ref, wmask_ref,
               fcw_ref, fcb_ref, out_ref, emb_acc):
        v = pl.program_id(1)

        # ---- embedding lookup: one-hot(bf16) @ emb-tile(bf16), accumulated over
        #      vocab tiles into an f32 VMEM scratch (single MXU matmul per tile) ----
        local = tok_ref[...] - v * TV                              # (RB, 1) int32
        iota = lax.broadcasted_iota(jnp.int32, (RB, TV), 1)
        onehot = (iota == local).astype(jnp.bfloat16)              # exact in bf16
        partial = jnp.dot(onehot, emb_ref[...],
                          preferred_element_type=jnp.float32)      # (RB, D) f32

        @pl.when(v == 0)
        def _():
            emb_acc[...] = jnp.zeros_like(emb_acc)

        emb_acc[...] += partial

        # ---- last vocab tile: merged conv -> ReLU -> position mask -> maxpool
        #      -> fc -> ReLU -> utterance mask ----
        @pl.when(v == pl.num_programs(1) - 1)
        def _():
            emb_flat = emb_acc[...]                                # (RB, D) f32
            # Tap k of the im2col window = rows shifted up by k (XLU sublane
            # rotate). Rows that wrap into the next utterance only reach invalid
            # positions, which are zeroed by wmask below (after ReLU, so the
            # max-pool over valid positions is unaffected).
            taps = [emb_flat] + [pltpu.roll(emb_flat, RB - k, 0)
                                 for k in range(1, K_max)]
            windows = jnp.concatenate(taps, axis=1).astype(jnp.bfloat16)  # (RB,Kmax*D)
            conv = jnp.dot(windows, wstack_ref[...],
                           preferred_element_type=jnp.float32) + cbias_ref[...]
            conv = jnp.maximum(conv, 0.0).reshape(NB, W, C_pad)    # ReLU
            conv = conv * wmask_ref[...][None]                     # zero invalid pos
            pooled = jnp.max(conv, axis=1)                         # (NB, C_pad)
            feat = jnp.dot(pooled.astype(jnp.bfloat16), fcw_ref[...],
                           preferred_element_type=jnp.float32) + fcb_ref[...]
            feat = jnp.maximum(feat, 0.0)                          # fc + ReLU
            out_ref[...] = feat * umask_ref[...]                   # utterance mask

    return kernel


def _nbytes(shape, itemsize):
    n = itemsize
    for s in shape:
        n *= s
    return n


def cnn_feature_extractor_pallas(params, x, umask, kernel_sizes, *,
                                 utt_block=8, vocab_tile=64):
    num_utt, batch, W = x.shape
    N = num_utt * batch
    V, D = params["emb"].shape
    F = params["conv_w"][0].shape[-1]
    out_size = params["fc_w"].shape[1]
    n_conv = len(kernel_sizes)
    K_max = max(kernel_sizes)

    # --- utterance-row blocking (grid axis 0, "parallel"); blocks hold whole
    #     utterances so the roll-based im2col stays self-contained ---
    NB = N
    if N % utt_block == 0 and utt_block % 8 == 0 and utt_block < N:
        NB = utt_block
    RB = NB * W

    # --- vocab tiling (grid axis 1, accumulated) ---
    TV = max(8, min(vocab_tile, ((V + 7) // 8) * 8))
    TV = ((TV + 7) // 8) * 8
    V_pad = ((V + TV - 1) // TV) * TV

    # --- lane-dense paddings ---
    C_pad = ((n_conv * F + 127) // 128) * 128      # merged conv output lanes
    out_pad = ((out_size + 127) // 128) * 128      # fc output lanes
    KD = K_max * D

    # ---- wrapper-side layout plumbing (flat rows, stacked / zero-padded weights) ----
    tok = x.reshape(N * W, 1).astype(jnp.int32)
    mask = jnp.transpose(umask, (1, 0)).astype(jnp.float32).reshape(N, 1)

    emb_pad = jnp.zeros((V_pad, D), jnp.float32).at[:V].set(
        params["emb"].astype(jnp.float32)).astype(jnp.bfloat16)

    wstack = jnp.zeros((KD, C_pad), jnp.float32)   # merged conv weights
    cbias = jnp.zeros((1, C_pad), jnp.float32)     # merged conv bias
    wmask = jnp.zeros((W, C_pad), jnp.float32)     # per-conv valid-position mask
    for ci, (K, w, b) in enumerate(zip(kernel_sizes, params["conv_w"],
                                       params["conv_b"])):
        wstack = wstack.at[:K * D, ci * F:(ci + 1) * F].set(w.reshape(K * D, F))
        cbias = cbias.at[:, ci * F:(ci + 1) * F].set(b)
        wmask = wmask.at[:W - K + 1, ci * F:(ci + 1) * F].set(1.0)
    wstack = wstack.astype(jnp.bfloat16)

    fcw = jnp.zeros((C_pad, out_pad), jnp.float32).at[
        :n_conv * F, :out_size].set(params["fc_w"]).astype(jnp.bfloat16)
    fcb = jnp.zeros((1, out_pad), jnp.float32).at[:, :out_size].set(params["fc_b"])

    kernel = _make_cnn_kernel(K_max=K_max, NB=NB, W=W, D=D, TV=TV,
                              C_pad=C_pad, out_pad=out_pad)

    grid = (N // NB, V_pad // TV)

    # Resident footprint: double-buffered input/output blocks + f32 scratch.
    footprint = (2 * (_nbytes((RB, 1), 4) + _nbytes((NB, 1), 4)
                      + _nbytes((TV, D), 2) + _nbytes((KD, C_pad), 2)
                      + _nbytes((1, C_pad), 4) + _nbytes((W, C_pad), 4)
                      + _nbytes((C_pad, out_pad), 2) + _nbytes((1, out_pad), 4)
                      + _nbytes((NB, out_pad), 4))
                 + _nbytes((RB, D), 4))
    vmem_limit = int(min(max(8 * footprint, 16 * 1024 * 1024), 64 * 1024 * 1024))

    in_specs = [
        pl.BlockSpec((RB, 1), lambda i, v: (i, 0)),           # token ids
        pl.BlockSpec((NB, 1), lambda i, v: (i, 0)),           # utterance mask
        pl.BlockSpec((TV, D), lambda i, v: (v, 0)),           # embedding vocab tile
        pl.BlockSpec((KD, C_pad), lambda i, v: (0, 0)),       # stacked conv weights
        pl.BlockSpec((1, C_pad), lambda i, v: (0, 0)),        # stacked conv bias
        pl.BlockSpec((W, C_pad), lambda i, v: (0, 0)),        # valid-position mask
        pl.BlockSpec((C_pad, out_pad), lambda i, v: (0, 0)),  # fc weight (padded)
        pl.BlockSpec((1, out_pad), lambda i, v: (0, 0)),      # fc bias (padded)
    ]

    feat = pl.pallas_call(
        kernel,
        out_shape=jax.ShapeDtypeStruct((N, out_pad), jnp.float32),
        grid_spec=pltpu.PrefetchScalarGridSpec(
            num_scalar_prefetch=0,
            grid=grid,
            in_specs=in_specs,
            out_specs=pl.BlockSpec((NB, out_pad), lambda i, v: (i, 0)),
            scratch_shapes=[pltpu.VMEM((RB, D), jnp.float32)]),
        compiler_params=pltpu.CompilerParams(
            dimension_semantics=("parallel", "arbitrary"),
            vmem_limit_bytes=vmem_limit),
    )(tok, mask, emb_pad, wstack, cbias, wmask, fcw, fcb)

    return feat[:, :out_size].reshape(num_utt, batch, out_size)


# ---------------- plain-JAX reference (mirrors PyTorch semantics) ----------------
def cnn_feature_extractor_ref(params, x, umask, kernel_sizes):
    hp = lax.Precision.HIGHEST
    num_utt, batch, W = x.shape
    N = num_utt * batch
    emb = params["emb"][x.reshape(N, W)]                       # (N, W, D) gather
    pooled = []
    for K, w, b in zip(kernel_sizes, params["conv_w"], params["conv_b"]):
        w_out = W - K + 1
        Fp = w.shape[-1]
        acc = jnp.zeros((N, w_out, Fp), jnp.float32)
        for k in range(K):
            acc = acc + jnp.einsum("nwd,df->nwf", emb[:, k:k + w_out, :], w[k],
                                   precision=hp)
        conv = jax.nn.relu(acc + b[None, :, :])                # Conv1d bias + ReLU
        pooled.append(jnp.max(conv, axis=1))                   # max_pool1d over words
    concated = jnp.concatenate(pooled, axis=1)
    feat = jax.nn.relu(jnp.dot(concated, params["fc_w"], precision=hp)
                       + params["fc_b"])
    feat = feat.reshape(num_utt, batch, -1)
    mask = jnp.transpose(umask, (1, 0))[:, :, None]            # (num_utt, batch, 1)
    return feat * mask


def init_params(key, vocab_size, embedding_dim, filters, kernel_sizes, output_size):
    n = len(kernel_sizes)
    keys = jax.random.split(key, 2 * n + 3)

    def unif(k, shape, fan_in):
        bound = 1.0 / (fan_in ** 0.5)
        return jax.random.uniform(k, shape, jnp.float32, -bound, bound)

    params = {"emb": jax.random.normal(keys[0], (vocab_size, embedding_dim),
                                       jnp.float32)}
    conv_w, conv_b = [], []
    for i, K in enumerate(kernel_sizes):
        fan = embedding_dim * K
        conv_w.append(unif(keys[1 + 2 * i], (K, embedding_dim, filters), fan))
        conv_b.append(unif(keys[2 + 2 * i], (1, filters), fan))
    params["conv_w"] = conv_w
    params["conv_b"] = conv_b
    fc_in = n * filters
    params["fc_w"] = unif(keys[2 * n + 1], (fc_in, output_size), fc_in)
    params["fc_b"] = unif(keys[2 * n + 2], (1, output_size), fc_in)
    return params


if __name__ == "__main__":
    vocab_size, embedding_dim = 100, 32
    filters, kernel_sizes, output_size = 32, (3, 4, 5), 32
    num_utt, batch, num_words = 8, 2, 16

    key = jax.random.PRNGKey(0)
    kp, kx, km = jax.random.split(key, 3)
    params = init_params(kp, vocab_size, embedding_dim, filters, kernel_sizes,
                         output_size)

    x = jax.random.randint(kx, (num_utt, batch, num_words), 0, vocab_size,
                           dtype=jnp.int32)
    umask = (jax.random.uniform(km, (batch, num_utt)) > 0.25).astype(jnp.float32)

    feat = cnn_feature_extractor_pallas(params, x, umask, kernel_sizes)
    jax.block_until_ready(feat)

    feat_ref = cnn_feature_extractor_ref(params, x, umask, kernel_sizes)
    assert feat.shape == (num_utt, batch, output_size)
    # Tolerance covers bf16 operand rounding of the embedding table / weights
    # (~1e-3-level after accumulation in f32); a wrong window / weight layout
    # would be off by O(1).
    assert jnp.allclose(feat, feat_ref, atol=2e-2, rtol=2e-2), \
        "features mismatch vs reference"

    print("KERNEL_OK")
</pallas_src>

<mosaic_0001>
module attributes {stable_mosaic.version = 11 : i64} {
  func.func @kernel(%arg0: i32, %arg1: i32, %arg2: memref<128x1xi32, #tpu.memory_space<vmem>>, %arg3: memref<8x1xf32, #tpu.memory_space<vmem>>, %arg4: memref<64x32xbf16, #tpu.memory_space<vmem>>, %arg5: memref<160x128xbf16, #tpu.memory_space<vmem>>, %arg6: memref<1x128xf32, #tpu.memory_space<vmem>>, %arg7: memref<16x128xf32, #tpu.memory_space<vmem>>, %arg8: memref<128x128xbf16, #tpu.memory_space<vmem>>, %arg9: memref<1x128xf32, #tpu.memory_space<vmem>>, %arg10: memref<8x128xf32, #tpu.memory_space<vmem>>, %arg11: memref<128x32xf32, #tpu.memory_space<vmem>>) attributes {dimension_semantics = [#tpu.dimension_semantics<parallel>, #tpu.dimension_semantics<arbitrary>], iteration_bounds = array<i64: 2, 2>, scalar_prefetch = 0 : i64, scratch_operands = 1 : i64, tpu.core_type = #tpu.core_type<tc>, window_params = [{transform_indices = @transform_0, window_bounds = array<i64: 128, 1>}, {transform_indices = @transform_1, window_bounds = array<i64: 8, 1>}, {transform_indices = @transform_2, window_bounds = array<i64: 64, 32>}, {pipeline_mode = #tpu.pipeline_mode<synchronous>, transform_indices = @transform_3, window_bounds = array<i64: 160, 128>}, {pipeline_mode = #tpu.pipeline_mode<synchronous>, transform_indices = @transform_4, window_bounds = array<i64: 1, 128>}, {pipeline_mode = #tpu.pipeline_mode<synchronous>, transform_indices = @transform_5, window_bounds = array<i64: 16, 128>}, {pipeline_mode = #tpu.pipeline_mode<synchronous>, transform_indices = @transform_6, window_bounds = array<i64: 128, 128>}, {pipeline_mode = #tpu.pipeline_mode<synchronous>, transform_indices = @transform_7, window_bounds = array<i64: 1, 128>}, {transform_indices = @transform_8, window_bounds = array<i64: 8, 128>}]} {
    %c0 = arith.constant 0 : index
    %c0_0 = arith.constant 0 : index
    %0 = vector.load %arg2[%c0, %c0_0] : memref<128x1xi32, #tpu.memory_space<vmem>>, vector<128x1xi32>
    %c64_i32 = arith.constant 64 : i32
    %1 = arith.muli %arg1, %c64_i32 : i32
    %2 = vector.broadcast %1 : i32 to vector<128x1xi32>
    %3 = arith.subi %0, %2 : vector<128x1xi32>
    %4 = tpu.iota {dimensions = array<i32: 1>} : vector<128x64xi32>
    %5 = vector.broadcast %3 : vector<128x1xi32> to vector<128x64xi32>
    %6 = arith.cmpi eq, %4, %5 : vector<128x64xi32>
    %7 = arith.extui %6 : vector<128x64xi1> to vector<128x64xi32>
    %8 = arith.sitofp %7 : vector<128x64xi32> to vector<128x64xf32>
    %9 = arith.truncf %8 : vector<128x64xf32> to vector<128x64xbf16>
    %c0_1 = arith.constant 0 : index
    %c0_2 = arith.constant 0 : index
    %10 = vector.load %arg4[%c0_1, %c0_2] : memref<64x32xbf16, #tpu.memory_space<vmem>>, vector<64x32xbf16>
    %cst = arith.constant dense<0.000000e+00> : vector<128x32xf32>
    %11 = tpu.matmul %9, %10, %cst {dimension_numbers = #tpu.dot_dimension_numbers<[1], [0], [0], [1], [0, 0, 1, 1], [], []>} : vector<128x64xbf16>, vector<64x32xbf16>, vector<128x32xf32> -> vector<128x32xf32>
    %c0_i32 = arith.constant 0 : i32
    %12 = arith.cmpi eq, %arg1, %c0_i32 : i32
    %13 = arith.extui %12 : i1 to i32
    %c0_i32_3 = arith.constant 0 : i32
    %14 = arith.cmpi ne, %13, %c0_i32_3 : i32
    scf.if %14 {
      %cst_9 = arith.constant 0.000000e+00 : f32
      %21 = vector.broadcast %cst_9 : f32 to vector<128x32xf32>
      %c0_10 = arith.constant 0 : index
      %c0_11 = arith.constant 0 : index
      %22 = vector.load %arg11[%c0_10, %c0_11] : memref<128x32xf32, #tpu.memory_space<vmem>>, vector<128x32xf32>
      tpu.vector_store %arg11[%c0_10, %c0_11], %21 {strides = array<i32>} : memref<128x32xf32, #tpu.memory_space<vmem>>, vector<128x32xf32>,
    } else {
    }
    %c0_4 = arith.constant 0 : index
    %c0_5 = arith.constant 0 : index
    %15 = vector.load %arg11[%c0_4, %c0_5] : memref<128x32xf32, #tpu.memory_space<vmem>>, vector<128x32xf32>
    %16 = arith.addf %15, %11 : vector<128x32xf32>
    %c0_6 = arith.constant 0 : index
    %c0_7 = arith.constant 0 : index
    %17 = vector.load %arg11[%c0_6, %c0_7] : memref<128x32xf32, #tpu.memory_space<vmem>>, vector<128x32xf32>
    tpu.vector_store %arg11[%c0_6, %c0_7], %16 {strides = array<i32>} : memref<128x32xf32, #tpu.memory_space<vmem>>, vector<128x32xf32>,
    %c1_i32 = arith.constant 1 : i32
    %18 = arith.cmpi eq, %arg1, %c1_i32 : i32
    %19 = arith.extui %18 : i1 to i32
    %c0_i32_8 = arith.constant 0 : i32
    %20 = arith.cmpi ne, %19, %c0_i32_8 : i32
    scf.if %20 {
      %c0_9 = arith.constant 0 : index
      %c0_10 = arith.constant 0 : index
      %21 = vector.load %arg11[%c0_9, %c0_10] : memref<128x32xf32, #tpu.memory_space<vmem>>, vector<128x32xf32>
      %c127_i32 = arith.constant 127 : i32
      %22 = tpu.dynamic_rotate %21 by %c127_i32 dim 0 : vector<128x32xf32>, i32 -> vector<128x32xf32>
      %c126_i32 = arith.constant 126 : i32
      %23 = tpu.dynamic_rotate %21 by %c126_i32 dim 0 : vector<128x32xf32>, i32 -> vector<128x32xf32>
      %c125_i32 = arith.constant 125 : i32
      %24 = tpu.dynamic_rotate %21 by %c125_i32 dim 0 : vector<128x32xf32>, i32 -> vector<128x32xf32>
      %c124_i32 = arith.constant 124 : i32
      %25 = tpu.dynamic_rotate %21 by %c124_i32 dim 0 : vector<128x32xf32>, i32 -> vector<128x32xf32>
      %26 = tpu.concatenate %21, %22, %23, %24, %25 in 1 : vector<128x32xf32>, vector<128x32xf32>, vector<128x32xf32>, vector<128x32xf32>, vector<128x32xf32> -> vector<128x160xf32>
      %27 = arith.truncf %26 : vector<128x160xf32> to vector<128x160xbf16>
      %c0_11 = arith.constant 0 : index
      %c0_12 = arith.constant 0 : index
      %28 = vector.load %arg5[%c0_11, %c0_12] : memref<160x128xbf16, #tpu.memory_space<vmem>>, vector<160x128xbf16>
      %cst_13 = arith.constant dense<0.000000e+00> : vector<128x128xf32>
      %29 = tpu.matmul %27, %28, %cst_13 {dimension_numbers = #tpu.dot_dimension_numbers<[1], [0], [0], [1], [0, 0, 1, 1], [], []>} : vector<128x160xbf16>, vector<160x128xbf16>, vector<128x128xf32> -> vector<128x128xf32>
      %c0_14 = arith.constant 0 : index
      %c0_15 = arith.constant 0 : index
      %30 = vector.load %arg6[%c0_14, %c0_15] : memref<1x128xf32, #tpu.memory_space<vmem>>, vector<1x128xf32>
      %31 = vector.broadcast %30 : vector<1x128xf32> to vector<128x128xf32>
      %32 = arith.addf %29, %31 : vector<128x128xf32>
      %cst_16 = arith.constant 0.000000e+00 : f32
      %33 = vector.broadcast %cst_16 : f32 to vector<128x128xf32>
      %34 = arith.maximumf %32, %33 : vector<128x128xf32>
      %35 = vector.shape_cast %34 : vector<128x128xf32> to vector<8x16x128xf32>
      %c0_17 = arith.constant 0 : index
      %c0_18 = arith.constant 0 : index
      %36 = vector.load %arg7[%c0_17, %c0_18] : memref<16x128xf32, #tpu.memory_space<vmem>>, vector<16x128xf32>
      %37 = vector.shape_cast %36 : vector<16x128xf32> to vector<1x16x128xf32>
      %38 = vector.broadcast %37 : vector<1x16x128xf32> to vector<8x16x128xf32>
      %39 = arith.mulf %35, %38 : vector<8x16x128xf32>
      %cst_19 = arith.constant dense<0xFF800000> : vector<8x128xf32>
      %40 = vector.multi_reduction <maximumf>, %39, %cst_19 [1] : vector<8x16x128xf32> to vector<8x128xf32>
      %41 = arith.truncf %40 : vector<8x128xf32> to vector<8x128xbf16>
      %c0_20 = arith.constant 0 : index
      %c0_21 = arith.constant 0 : index
      %42 = vector.load %arg8[%c0_20, %c0_21] : memref<128x128xbf16, #tpu.memory_space<vmem>>, vector<128x128xbf16>
      %cst_22 = arith.constant dense<0.000000e+00> : vector<8x128xf32>
      %43 = tpu.matmul %41, %42, %cst_22 {dimension_numbers = #tpu.dot_dimension_numbers<[1], [0], [0], [1], [0, 0, 1, 1], [], []>} : vector<8x128xbf16>, vector<128x128xbf16>, vector<8x128xf32> -> vector<8x128xf32>
      %c0_23 = arith.constant 0 : index
      %c0_24 = arith.constant 0 : index
      %44 = vector.load %arg9[%c0_23, %c0_24] : memref<1x128xf32, #tpu.memory_space<vmem>>, vector<1x128xf32>
      %45 = vector.broadcast %44 : vector<1x128xf32> to vector<8x128xf32>
      %46 = arith.addf %43, %45 : vector<8x128xf32>
      %cst_25 = arith.constant 0.000000e+00 : f32
      %47 = vector.broadcast %cst_25 : f32 to vector<8x128xf32>
      %48 = arith.maximumf %46, %47 : vector<8x128xf32>
      %c0_26 = arith.constant 0 : index
      %c0_27 = arith.constant 0 : index
      %49 = vector.load %arg3[%c0_26, %c0_27] : memref<8x1xf32, #tpu.memory_space<vmem>>, vector<8x1xf32>
      %50 = vector.broadcast %49 : vector<8x1xf32> to vector<8x128xf32>
      %51 = arith.mulf %48, %50 : vector<8x128xf32>
      %c0_28 = arith.constant 0 : index
      %c0_29 = arith.constant 0 : index
      %52 = vector.load %arg10[%c0_28, %c0_29] : memref<8x128xf32, #tpu.memory_space<vmem>>, vector<8x128xf32>
      tpu.vector_store %arg10[%c0_28, %c0_29], %51 {strides = array<i32>} : memref<8x128xf32, #tpu.memory_space<vmem>>, vector<8x128xf32>,
    } else {
    }
    return
  }
  func.func @transform_0(%arg0: i32, %arg1: i32) -> (i32, i32) {
    %c0_i32 = arith.constant 0 : i32
    %c0_i32_0 = arith.constant 0 : i32
    return %arg0, %c0_i32 : i32, i32
  }
  func.func @transform_1(%arg0: i32, %arg1: i32) -> (i32, i32) {
    %c0_i32 = arith.constant 0 : i32
    %c0_i32_0 = arith.constant 0 : i32
    return %arg0, %c0_i32 : i32, i32
  }
  func.func @transform_2(%arg0: i32, %arg1: i32) -> (i32, i32) {
    %c0_i32 = arith.constant 0 : i32
    %c0_i32_0 = arith.constant 0 : i32
    return %arg1, %c0_i32 : i32, i32
  }
  func.func @transform_3(%arg0: i32, %arg1: i32) -> (i32, i32) {
    %c0_i32 = arith.constant 0 : i32
    %c0_i32_0 = arith.constant 0 : i32
    %c0_i32_1 = arith.constant 0 : i32
    return %c0_i32, %c0_i32_0 : i32, i32
  }
  func.func @transform_4(%arg0: i32, %arg1: i32) -> (i32, i32) {
    %c0_i32 = arith.constant 0 : i32
    %c0_i32_0 = arith.constant 0 : i32
    %c0_i32_1 = arith.constant 0 : i32
    return %c0_i32, %c0_i32_0 : i32, i32
  }
  func.func @transform_5(%arg0: i32, %arg1: i32) -> (i32, i32) {
    %c0_i32 = arith.constant 0 : i32
    %c0_i32_0 = arith.constant 0 : i32
    %c0_i32_1 = arith.constant 0 : i32
    return %c0_i32, %c0_i32_0 : i32, i32
  }
  func.func @transform_6(%arg0: i32, %arg1: i32) -> (i32, i32) {
    %c0_i32 = arith.constant 0 : i32
    %c0_i32_0 = arith.constant 0 : i32
    %c0_i32_1 = arith.constant 0 : i32
    return %c0_i32, %c0_i32_0 : i32, i32
  }
  func.func @transform_7(%arg0: i32, %arg1: i32) -> (i32, i32) {
    %c0_i32 = arith.constant 0 : i32
    %c0_i32_0 = arith.constant 0 : i32
    %c0_i32_1 = arith.constant 0 : i32
    return %c0_i32, %c0_i32_0 : i32, i32
  }
  func.func @transform_8(%arg0: i32, %arg1: i32) -> (i32, i32) {
    %c0_i32 = arith.constant 0 : i32
    %c0_i32_0 = arith.constant 0 : i32
    return %arg0, %c0_i32 : i32, i32
  }
}

</mosaic_0001>

<bundles_post_ra>
// kernel: tpu_custom_call.1
= control target key start
LH: loop header
LB: loop body
LE: loop exit
PB: predicated region body
PF: predicated region fallthrough
CT: control target
= control target key end

     0   :  { %s2952_s0 = inlined_call_operand.vmem [shape: s32[256,1], index: 0, kind: input, shape index: {}]   ;;  %s2953_s1 = inlined_call_operand.vmem [shape: f32[16,1], index: 1, kind: input, shape index: {}]   ;;  %s2954_s2 = inlined_call_operand.vmem [shape: bf16[128,32], index: 2, kind: input, shape index: {}]   ;;  %s2955_s3 = inlined_call_operand.vmem [shape: bf16[160,128], index: 3, kind: input, shape index: {}]   ;;  %s2956_s4 = inlined_call_operand.vmem [shape: f32[1,128], index: 4, kind: input, shape index: {}]   ;;  %s2957_s5 = inlined_call_operand.vmem [shape: f32[16,128], index: 5, kind: input, shape index: {}]   ;;  %s2958_s6 = inlined_call_operand.vmem [shape: bf16[128,128], index: 6, kind: input, shape index: {}]   ;;  %s2959_s7 = inlined_call_operand.vmem [shape: f32[1,128], index: 7, kind: input, shape index: {}]   ;;  %s2960_s8 = inlined_call_operand.hbm [shape: f32[16,128], index: 8, kind: output, shape index: {}]  }
   0x1   :  { %2963 = sst [smem:[#allocation8_spill]] %s2952_s0 }
   0x2   :  { %13 = vsyncpa [#allocation4], 0 }
   0x3   :  { %15 = vsyncpa [#allocation4 + $0x1], 0  ;;  %s2220_s27 = smov 0   ;;  %s2222_s28 = smov 0  }
   0x4   :  { %s2224_s29 = smov 0   ;;  %s2226_s30 = smov 0  }
   0x5   :  { %s2228_s9 = smov 0   ;;  %s2230_s10 = smov 0  }
   0x6   :  { %s2232_s11 = smov 0   ;;  %s2234_s12 = smov 0  }
   0x7 LB: > { %s1699_s13 = sadd.s32 4294967295, %s2163_s12   ;;  %s1700_s14 = sadd.s32 4294967294, %s2163_s12   ;;  %s2163_s12 = sphi %s2234_s12, %s21_s12   ;;  %s2159_s11 = sphi %s2232_s11, %s2978_s11   ;;  %s2155_s10 = sphi %s2230_s10, %s2977_s10   ;;  %s2151_s9 = sphi %s2228_s9, %s2976_s9   ;;  %s2147_s30 = sphi %s2226_s30, %s2975_s30   ;;  %s2143_s29 = sphi %s2224_s29, %s2974_s29   ;;  %s2139_s28 = sphi %s2222_s28, %s2973_s28   ;;  %s2135_s27 = sphi %s2220_s27, %s2972_s27  }
   0x8   : > { %s30_s15 = sadd.s32 1, %s2155_s10  ;;  %s33_s16 = sadd.s32 1, %s2159_s11 }
   0x9   : > { %p31_p0 = scmp.ge.s32.totalorder %s30_s15, 2  ;;  %p233_p1 = scmp.ne.s32.totalorder %s2143_s29, %s2139_s28 }
   0xa   : > { %p234_p2 = scmp.eq.s32.totalorder %s1699_s13, 3  ;;  %p239_p4 = scmp.ne.s32.totalorder %s2139_s28, %s2135_s27 }
   0xb   : > { %s2980_s15 = smov (%p31_p0, %s30_s15), 0  ;;  %s2982_s16 = smov (!%p31_p0, %s33_s16), %s2159_s11 }
   0xc   : > { %2964 = sst [smem:[#allocation6_spill]] %s2980_s15  ;;  %p2269_p3 = por %p234_p2, %p233_p1 }
   0xd   : > { %p35_p5 = scmp.ge.s32.totalorder %s2982_s16, 2  ;;  %p240_p6 = scmp.eq.s32.totalorder %s1700_s14, 3 }
   0xe   : > { %p1703_p7 = scmp.ge.s32.totalorder %s2163_s12, 1  ;;  %p298_p8 = scmp.lt.s32.totalorder %s2163_s12, 5 }
   0xf   : > { %s2984_s16 = smov (%p35_p5, %s2982_s16), 0  ;;  %p2279_p9 = por %p240_p6, %p239_p4 }
  0x10   : > { %2966 = sst [smem:[#allocation7_spill]] %s2984_s16  ;;  %p299_p10 = pnand %p1703_p7, %p298_p8 }
  0x11   : > { %s220_s19 = ssub.s32 %s2159_s11, %s2984_s16  ;;  %s223_s20 = sadd.s32 1, %s2143_s29 }
  0x12   : > { %p221_p11 = scmp.eq.s32.totalorder %s220_s19, 0  ;;  %302 = sbr.rel (%p299_p10) target bundleno = 1046 (0x416), region = 52 }
  0x13   : > { %s1705_s22 = sshll.u32 (!%p299_p10), %s2151_s9, 4  ;;  %s1710_s23 = sshll.u32 (!%p299_p10), %s2147_s30, 6 }
  0x14   : > { %s2287_s21 = scalar_select %p221_p11, %s2143_s29, %s223_s20  }
  0x15   : > { %p342_p12 = scmp.lt.s32.totalorder (!%p299_p10), %s1705_s22, 31  ;;  %s2961_s24 = sand.u32 (!%p299_p10), 1, %s2139_s28  }
  0x16   : > { %s2294_s25 = sshll.u32 (!%p299_p10), %s2961_s24, 3  ;;  %p347_p13 = scmp.lt.s32.totalorder (!%p299_p10), %s2151_s9, 1 }
  0x17   : > { %v2165_v0 = vmov 0   ;;  %s2986_s22 = smov (!%p342_p12, %s1705_s22), 31  ;;  %s1708_s26 = sshll.u32 %s2147_s30, 3  ;;  %v2298_v1 = vstv %s1710_s23  ;;  %v392_v38 = vlaneseq  ;;  %vm530_vm4 = vcmask 523264  }
  0x18   : > { %1927 = vset.pattern.permute.xlu1 %v2165_v0  ;;  %1926 = vset.pattern.permute.xlu0 %v2165_v0  ;;  %s1706_s13 = sshll.u32 %s2986_s22, 3  ;;  %p352_p0 = scmp.lt.s32.totalorder %s1708_s26, 15  ;;  %v2166_v44 = vmov 0.0  }
  0x19   : > { %s2968_s0 = sld [smem:[#allocation8_spill]]  ;;  %v2347_v39 = vand.u32 127, %v392_v38  ;;  %p1739_p1 = scmp.ne.s32.totalorder %s2147_s30, 0 }
  0x1a   : > { %s348_s24 = scalar_select %p347_p13, %s2151_s9, 1 }
  0x1b   : > { %s2988_s26 = smov (!%p352_p0, %s1708_s26), 15 }
  0x1c   : > { %s1707_s22 = sshll.u32 %s348_s24, 3  ;;  %s1709_s19 = sshll.u32 %s2988_s26, 2 }
  0x1d   : > { %s2317_s14 = scalar_lea.vmem %s2953_s1, %s1707_s22  ;;  %s355_s15 = scalar_lea.vmem %s2954_s2, %s1709_s19 }
  0x1e   : > { %v1928_v13 = vld [vmem:[%s355_s15 + $0x18] sm:$0xff]   ;;  %v1929_v16 = vld [vmem:[%s355_s15 + $0x10] sm:$0xff]   ;;  %v1930_v18 = vld [vmem:[%s355_s15 + $0x8] sm:$0xff]  }
  0x1f   : > { %s2303_s20 = scalar_lea.vmem %s2968_s0, %s1706_s13  ;;  %1794 = vmatprep.subr.bf16.mxu0 %v1928_v13  ;;  %1838 = vmatprep.subr.bf16.mxu1 %v1928_v13  ;;  %v1931_v23 = vld [vmem:[%s355_s15] sm:$0xff]   ;;  %s340_s0 = scalar_lea.vmem [#allocation3], %s2294_s25 }
  0x20   : > { %v366_v2 = vld [vmem:[%s2303_s20 + $0x40] sm:$0xff]  ;;  %v367_v4 = vld [vmem:[%s2303_s20 + $0x48] sm:$0xff]  ;;  %v361_v10 = vld [vmem:[%s2303_s20 + $0x18] sm:$0xff]  ;;  %1795 = vmatpush3.bf16.msra.mxu0 %v1928_v13  ;;  %1842 = vmatpush3.bf16.msra.mxu1 %v1928_v13 }
  0x21   : > { %v358_v3 = vld [vmem:[%s2303_s20] sm:$0xff]  ;;  %v384_v5 = vsub.s32 %v366_v2, %v2298_v1  ;;  %v359_v7 = vld [vmem:[%s2303_s20 + $0x8] sm:$0xff]  ;;  %v385_v8 = vsub.s32 %v367_v4, %v2298_v1  ;;  %v360_v11 = vld [vmem:[%s2303_s20 + $0x10] sm:$0xff]  ;;  %v379_v14 = vsub.s32 %v361_v10, %v2298_v1  ;;  %1796 = vmatprep.subr.bf16.mxu0 %v1929_v16  ;;  %1839 = vmatprep.subr.bf16.mxu1 %v1929_v16 }
  0x22   : > { %v376_v6 = vsub.s32 %v358_v3, %v2298_v1  ;;  %v377_v9 = vsub.s32 %v359_v7, %v2298_v1  ;;  %v369_v12 = vld [vmem:[%s2303_s20 + $0x58] sm:$0xff]  ;;  %v378_v15 = vsub.s32 %v360_v11, %v2298_v1  ;;  %v368_v17 = vld [vmem:[%s2303_s20 + $0x50] sm:$0xff]  ;;  %v363_v21 = vld [vmem:[%s2303_s20 + $0x28] sm:$0xff] }
  0x23   : > { %419 = vperm.xlu1 %1927, %v384_v5   ;;  %v387_v19 = vsub.s32 %v369_v12, %v2298_v1  ;;  %v386_v20 = vsub.s32 %v368_v17, %v2298_v1  ;;  %v362_v22 = vld [vmem:[%s2303_s20 + $0x20] sm:$0xff]  ;;  %v381_v24 = vsub.s32 %v363_v21, %v2298_v1  ;;  %v371_v26 = vld [vmem:[%s2303_s20 + $0x68] sm:$0xff]  ;;  %v365_v30 = vld [vmem:[%s2303_s20 + $0x38] sm:$0xff] }
  0x24   : > { %395 = vperm.xlu0 %1926, %v376_v6   ;;  %1797 = vmatpush3.bf16.msra.mxu0 %v1929_v16  ;;  %v380_v25 = vsub.s32 %v362_v22, %v2298_v1  ;;  %v370_v27 = vld [vmem:[%s2303_s20 + $0x60] sm:$0xff]  ;;  %v389_v28 = vsub.s32 %v371_v26, %v2298_v1  ;;  %v364_v31 = vld [vmem:[%s2303_s20 + $0x30] sm:$0xff]  ;;  %v383_v32 = vsub.s32 %v365_v30, %v2298_v1  ;;  %v373_v34 = vld [vmem:[%s2303_s20 + $0x78] sm:$0xff] }
  0x25   : > { %1843 = vmatpush3.bf16.msra.mxu1 %v1929_v16  ;;  %1798 = vmatprep.subr.bf16.mxu0 %v1930_v18  ;;  %v388_v29 = vsub.s32 %v370_v27, %v2298_v1  ;;  %v382_v33 = vsub.s32 %v364_v31, %v2298_v1  ;;  %v372_v35 = vld [vmem:[%s2303_s20 + $0x70] sm:$0xff]  ;;  %v391_v36 = vsub.s32 %v373_v34, %v2298_v1 }
  0x26   : > { %1840 = vmatprep.subr.bf16.mxu1 %v1930_v18  ;;  %v390_v37 = vsub.s32 %v372_v35, %v2298_v1 }
  0x27   : > { %422 = vperm.xlu1 %1927, %v385_v8  }
  0x28   : > { %398 = vperm.xlu0 %1926, %v377_v9   ;;  %1799 = vmatpush3.bf16.msra.mxu0 %v1930_v18 }
  0x29   : > { %1844 = vmatpush3.bf16.msra.mxu1 %v1930_v18  ;;  %1800 = vmatprep.subr.bf16.mxu0 %v1931_v23 }
  0x2a   : > { %1841 = vmatprep.subr.bf16.mxu1 %v1931_v23 }
  0x2b   : > { %404 = vperm.xlu1 %1927, %v379_v14  }
  0x2c   : > { %401 = vperm.xlu0 %1926, %v378_v15   ;;  %1801 = vmatpush3.bf16.msra.mxu0 %v1931_v23 }
  0x2d   : > { %1845 = vmatpush3.bf16.msra.mxu1 %v1931_v23 }
  0x2f   : > { %428 = vperm.xlu1 %1927, %v387_v19  }
  0x30   : > { %425 = vperm.xlu0 %1926, %v386_v20  }
  0x33   : > { %410 = vperm.xlu1 %1927, %v381_v24  }
  0x34   : > { %407 = vperm.xlu0 %1926, %v380_v25  }
  0x37   : > { %434 = vperm.xlu1 %1927, %v389_v28  }
  0x38   : > { %431 = vperm.xlu0 %1926, %v388_v29  }
  0x3b   : > { %416 = vperm.xlu1 %1927, %v383_v32  }
  0x3c   : > { %413 = vperm.xlu0 %1926, %v382_v33  }
  0x3f   : > { %440 = vperm.xlu1 %1927, %v391_v36  }
  0x40   : > { %437 = vperm.xlu0 %1926, %v390_v37  }
  0x9e   : > { %v420_v40 = vpop.permute.xlu1 %419 }
  0x9f   : > { %v396_v41 = vpop.permute.xlu0 %395  ;;  %vm450_vm0 = vcmp.eq.s32.totalorder %v2347_v39, %v420_v40 }
  0xa0   : > { %vm442_vm1 = vcmp.eq.s32.totalorder %v2347_v39, %v396_v41  ;;  %v1719_v45 = vsel %vm450_vm0, 1.0, %v2166_v44 }
  0xa1   : > { %v1711_v46 = vsel %vm442_vm1, 1.0, %v2166_v44 }
  0xa2   : > { %v423_v42 = vpop.permute.xlu1 %422 }
  0xa3   : > { %v399_v43 = vpop.permute.xlu0 %398  ;;  %vm451_vm2 = vcmp.eq.s32.totalorder %v2347_v39, %v423_v42 }
  0xa4   : > { %vm443_vm3 = vcmp.eq.s32.totalorder %v2347_v39, %v399_v43  ;;  %v1720_v47 = vsel %vm451_vm2, 1.0, %v2166_v44 }
  0xa5   : > { %v1712_v48 = vsel %vm443_vm3, 1.0, %v2166_v44  ;;  %v494_v50 = vpack.c.bf16 %v1720_v47, %v1719_v45 }
  0xa6   : > { %v490_v49 = vpack.c.bf16 %v1712_v48, %v1711_v46  ;;  %v405_v51 = vpop.permute.xlu1 %404 }
  0xa7   : > { %v402_v52 = vpop.permute.xlu0 %401  ;;  %vm445_vm5 = vcmp.eq.s32.totalorder %v2347_v39, %v405_v51  ;;  %1810 = vmatprep.mubr.msk.bf16.mxu1 %vm530_vm4, %v494_v50 }
  0xa8   : > { %vm444_vm6 = vcmp.eq.s32.totalorder %v2347_v39, %v402_v52  ;;  %1802 = vmatprep.mubr.msk.bf16.mxu0 %vm530_vm4, %v490_v49  ;;  %v1714_v53 = vsel %vm445_vm5, 1.0, %v2166_v44 }
  0xa9   : > { %v1713_v54 = vsel %vm444_vm6, 1.0, %v2166_v44 }
  0xaa   : > { %v491_v55 = vpack.c.bf16 %v1714_v53, %v1713_v54  ;;  %v429_v56 = vpop.permute.xlu1 %428 }
  0xab   : > { %v426_v57 = vpop.permute.xlu0 %425  ;;  %vm453_vm7 = vcmp.eq.s32.totalorder %v2347_v39, %v429_v56 }
  0xac   : > { %vm452_vm8 = vcmp.eq.s32.totalorder %v2347_v39, %v426_v57  ;;  %1803 = vmatmul.mubr.msk.bf16.vlgmr.msra.gmra.mxu0 %vm530_vm4, %v491_v55  ;;  %v1722_v58 = vsel %vm453_vm7, 1.0, %v2166_v44 }
  0xad   : > { %v1721_v59 = vsel %vm452_vm8, 1.0, %v2166_v44 }
  0xae   : > { %v495_v60 = vpack.c.bf16 %v1722_v58, %v1721_v59  ;;  %v411_v61 = vpop.permute.xlu1 %410 }
  0xaf   : > { %v408_v62 = vpop.permute.xlu0 %407  ;;  %vm447_vm9 = vcmp.eq.s32.totalorder %v2347_v39, %v411_v61 }
  0xb0   : > { %vm446_vm10 = vcmp.eq.s32.totalorder %v2347_v39, %v408_v62  ;;  %1811 = vmatmul.mubr.msk.bf16.vlgmr.msra.gmra.mxu1 %vm530_vm4, %v495_v60  ;;  %v1716_v63 = vsel %vm447_vm9, 1.0, %v2166_v44 }
  0xb1   : > { %v1715_v0 = vsel %vm446_vm10, 1.0, %v2166_v44 }
  0xb2   : > { %v492_v1 = vpack.c.bf16 %v1716_v63, %v1715_v0  ;;  %v435_v2 = vpop.permute.xlu1 %434 }
  0xb3   : > { %v432_v3 = vpop.permute.xlu0 %431  ;;  %vm455_vm11 = vcmp.eq.s32.totalorder %v2347_v39, %v435_v2 }
  0xb4   : > { %vm454_vm12 = vcmp.eq.s32.totalorder %v2347_v39, %v432_v3  ;;  %1806 = vmatprep.mubr.msk.bf16.mxu0 %vm530_vm4, %v492_v1  ;;  %v1724_v4 = vsel %vm455_vm11, 1.0, %v2166_v44 }
  0xb5   : > { %v1723_v5 = vsel %vm454_vm12, 1.0, %v2166_v44 }
  0xb6   : > { %v496_v6 = vpack.c.bf16 %v1724_v4, %v1723_v5  ;;  %v417_v7 = vpop.permute.xlu1 %416 }
  0xb7   : > { %v414_v8 = vpop.permute.xlu0 %413  ;;  %vm449_vm13 = vcmp.eq.s32.totalorder %v2347_v39, %v417_v7 }
  0xb8   : > { %vm448_vm14 = vcmp.eq.s32.totalorder %v2347_v39, %v414_v8  ;;  %1814 = vmatprep.mubr.msk.bf16.mxu1 %vm530_vm4, %v496_v6  ;;  %v1718_v9 = vsel %vm449_vm13, 1.0, %v2166_v44 }
  0xb9   : > { %v1717_v10 = vsel %vm448_vm14, 1.0, %v2166_v44 }
  0xba   : > { %v493_v11 = vpack.c.bf16 %v1718_v9, %v1717_v10  ;;  %v441_v12 = vpop.permute.xlu1 %440 }
  0xbb   : > { %v438_v13 = vpop.permute.xlu0 %437  ;;  %vm457_vm15 = vcmp.eq.s32.totalorder %v2347_v39, %v441_v12 }
  0xbc   : > { %vm456_vm0 = vcmp.eq.s32.totalorder %v2347_v39, %v438_v13  ;;  %1807 = vmatmul.mubr.msk.bf16.gmra.mxu0 %vm530_vm4, %v493_v11  ;;  %v1726_v14 = vsel %vm457_vm15, 1.0, %v2166_v44 }
  0xbd   : > { %v1725_v15 = vsel %vm456_vm0, 1.0, %v2166_v44 }
  0xbe   : > { %v497_v16 = vpack.c.bf16 %v1726_v14, %v1725_v15 }
  0xc0   : > { %1815 = vmatmul.mubr.msk.bf16.gmra.mxu1 %vm530_vm4, %v497_v16 }
 0x16c   : > { %v1804_v17 = vpop.f32.mrf.mxu0 }
 0x16e   : > { %v589_v18 = vpop.f32.mrf.mxu0 }
 0x170   : > { %v1805_v19 = vpop.f32.mrf.mxu0  ;;  %v2373_v20 = vpop.f32.mrf.mxu1 }
 0x172   : > { %v592_v21 = vpop.f32.mrf.mxu0  ;;  %v621_v22 = vpop.f32.mrf.mxu1 }
 0x174   : > { %v1813_v23 = vpop.f32.mrf.mxu1 }
 0x176   : > { %v624_v24 = vpop.f32.mrf.mxu1 }
 0x17c   : > { %v1808_v25 = vpop.f32.mrf.mxu0 }
 0x17e   : > { %v605_v26 = vpop.f32.mrf.mxu0 }
 0x180   : > { %v1809_v27 = vpop.f32.mrf.mxu0  ;;  %v2375_v28 = vpop.f32.mrf.mxu1 }
 0x182   : > { %v608_v29 = vpop.f32.mrf.mxu0  ;;  %v637_v30 = vpop.f32.mrf.mxu1  ;;  %655 = sbr.rel (%p1739_p1) target bundleno = 400 (0x190), region = 56 }
 0x184   : > { %v2377_v31 = vpop.f32.mrf.mxu1 }
 0x186   : > { %v640_v32 = vpop.f32.mrf.mxu1 }
 0x187   : > { %vm656_vm1 = vcmask 261120   ;;  %v2167_v33 = vmov 0.0  }
 0x188   : > { %657 = vst.msk [vmem:[#allocation2] sm:$0xff] %vm656_vm1, %v2167_v33  ;;  %658 = vst.msk [vmem:[#allocation2 + $0x8] sm:$0xff] %vm656_vm1, %v2167_v33 }
 0x189   : > { %659 = vst.msk [vmem:[#allocation2 + $0x10] sm:$0xff] %vm656_vm1, %v2167_v33  ;;  %660 = vst.msk [vmem:[#allocation2 + $0x18] sm:$0xff] %vm656_vm1, %v2167_v33 }
 0x18a   : > { %661 = vst.msk [vmem:[#allocation2 + $0x20] sm:$0xff] %vm656_vm1, %v2167_v33  ;;  %662 = vst.msk [vmem:[#allocation2 + $0x28] sm:$0xff] %vm656_vm1, %v2167_v33 }
 0x18b   : > { %663 = vst.msk [vmem:[#allocation2 + $0x30] sm:$0xff] %vm656_vm1, %v2167_v33  ;;  %664 = vst.msk [vmem:[#allocation2 + $0x38] sm:$0xff] %vm656_vm1, %v2167_v33 }
 0x18c   : > { %665 = vst.msk [vmem:[#allocation2 + $0x40] sm:$0xff] %vm656_vm1, %v2167_v33  ;;  %666 = vst.msk [vmem:[#allocation2 + $0x48] sm:$0xff] %vm656_vm1, %v2167_v33 }
 0x18d   : > { %667 = vst.msk [vmem:[#allocation2 + $0x50] sm:$0xff] %vm656_vm1, %v2167_v33  ;;  %668 = vst.msk [vmem:[#allocation2 + $0x58] sm:$0xff] %vm656_vm1, %v2167_v33 }
 0x18e   : > { %669 = vst.msk [vmem:[#allocation2 + $0x60] sm:$0xff] %vm656_vm1, %v2167_v33  ;;  %670 = vst.msk [vmem:[#allocation2 + $0x68] sm:$0xff] %vm656_vm1, %v2167_v33 }
 0x18f   : > { %671 = vst.msk [vmem:[#allocation2 + $0x70] sm:$0xff] %vm656_vm1, %v2167_v33  ;;  %672 = vst.msk [vmem:[#allocation2 + $0x78] sm:$0xff] %vm656_vm1, %v2167_v33 }
 0x190 PF: > { %v673_v34 = vld [vmem:[#allocation2] sm:$0xff]  ;;  %vm705_vm2 = vcmask 261120   ;;  %v674_v35 = vld [vmem:[#allocation2 + $0x8] sm:$0xff]  ;;  %v675_v36 = vld [vmem:[#allocation2 + $0x10] sm:$0xff]  ;;  %p1740_p2 = scmp.ne.s32.totalorder %s2147_s30, 1 }
 0x191   : > { %v689_v37 = vadd.f32 %v673_v34, %v589_v18  ;;  %v690_v39 = vadd.f32 %v674_v35, %v592_v21  ;;  %v691_v40 = vadd.f32 %v1804_v17, %v675_v36  ;;  %v676_v41 = vld [vmem:[#allocation2 + $0x18] sm:$0xff]  ;;  %v677_v42 = vld [vmem:[#allocation2 + $0x20] sm:$0xff]  ;;  %v678_v43 = vld [vmem:[#allocation2 + $0x28] sm:$0xff]  ;;  %s2168_s30 = smov (!%p1740_p2), 32   ;;  %s2169_s15 = smov (!%p1740_p2), 96  }
 0x192   : > { %v692_v44 = vadd.f32 %v1805_v19, %v676_v41  ;;  %v693_v45 = vadd.f32 %v677_v42, %v605_v26  ;;  %v694_v46 = vadd.f32 %v678_v43, %v608_v29  ;;  %v679_v47 = vld [vmem:[#allocation2 + $0x30] sm:$0xff]  ;;  %v680_v48 = vld [vmem:[#allocation2 + $0x38] sm:$0xff]  ;;  %s2170_s16 = smov (!%p1740_p2), 64  }
 0x193   : > { %v681_v49 = vld [vmem:[#allocation2 + $0x40] sm:$0xff]  ;;  %706 = vst.msk [vmem:[#allocation2] sm:$0xff] %vm705_vm2, %v689_v37  ;;  %707 = vst.msk [vmem:[#allocation2 + $0x8] sm:$0xff] %vm705_vm2, %v690_v39  ;;  %v695_v50 = vadd.f32 %v1808_v25, %v679_v47  ;;  %v696_v51 = vadd.f32 %v1809_v27, %v680_v48  ;;  %v682_v53 = vld [vmem:[#allocation2 + $0x48] sm:$0xff] }
 0x194   : > { %708 = vst.msk [vmem:[#allocation2 + $0x10] sm:$0xff] %vm705_vm2, %v691_v40  ;;  %v697_v52 = vadd.f32 %v681_v49, %v621_v22  ;;  %v683_v54 = vld [vmem:[#allocation2 + $0x50] sm:$0xff]  ;;  %v684_v55 = vld [vmem:[#allocation2 + $0x58] sm:$0xff]  ;;  %709 = vst.msk [vmem:[#allocation2 + $0x18] sm:$0xff] %vm705_vm2, %v692_v44  ;;  %v698_v56 = vadd.f32 %v682_v53, %v624_v24 }
 0x195   : > { %710 = vst.msk [vmem:[#allocation2 + $0x20] sm:$0xff] %vm705_vm2, %v693_v45  ;;  %711 = vst.msk [vmem:[#allocation2 + $0x28] sm:$0xff] %vm705_vm2, %v694_v46  ;;  %v699_v57 = vadd.f32 %v2373_v20, %v683_v54  ;;  %v700_v58 = vadd.f32 %v1813_v23, %v684_v55  ;;  %v685_v59 = vld [vmem:[#allocation2 + $0x60] sm:$0xff]  ;;  %v686_v60 = vld [vmem:[#allocation2 + $0x68] sm:$0xff] }
 0x196   : > { %v687_v61 = vld [vmem:[#allocation2 + $0x70] sm:$0xff]  ;;  %712 = vst.msk [vmem:[#allocation2 + $0x30] sm:$0xff] %vm705_vm2, %v695_v50  ;;  %713 = vst.msk [vmem:[#allocation2 + $0x38] sm:$0xff] %vm705_vm2, %v696_v51  ;;  %v701_v62 = vadd.f32 %v685_v59, %v637_v30  ;;  %v702_v63 = vadd.f32 %v686_v60, %v640_v32  ;;  %v688_v1 = vld [vmem:[#allocation2 + $0x78] sm:$0xff]  ;;  %725 = sbr.rel (%p1740_p2) target bundleno = 1022 (0x3fe), region = 60 }
 0x197   : > { %714 = vst.msk [vmem:[#allocation2 + $0x40] sm:$0xff] %vm705_vm2, %v697_v52  ;;  %v703_v0 = vadd.f32 %v2375_v28, %v687_v61  ;;  %715 = vst.msk [vmem:[#allocation2 + $0x48] sm:$0xff] %vm705_vm2, %v698_v56  ;;  %v704_v2 = vadd.f32 %v2377_v31, %v688_v1 }
 0x198   : > { %716 = vst.msk [vmem:[#allocation2 + $0x50] sm:$0xff] %vm705_vm2, %v699_v57  ;;  %717 = vst.msk [vmem:[#allocation2 + $0x58] sm:$0xff] %vm705_vm2, %v700_v58 }
 0x199   : > { %718 = vst.msk [vmem:[#allocation2 + $0x60] sm:$0xff] %vm705_vm2, %v701_v62  ;;  %719 = vst.msk [vmem:[#allocation2 + $0x68] sm:$0xff] %vm705_vm2, %v702_v63 }
 0x19a   : > { %720 = vst.msk [vmem:[#allocation2 + $0x70] sm:$0xff] %vm705_vm2, %v703_v0  ;;  %721 = vst.msk [vmem:[#allocation2 + $0x78] sm:$0xff] %vm705_vm2, %v704_v2 }
 0x19b   : > { %v2417_v3 = vld [vmem:[#allocation2] sm:$0xff]  ;;  %v2419_v4 = vld [vmem:[#allocation2 + $0x8] sm:$0xff]  ;;  %v2421_v5 = vld [vmem:[#allocation2 + $0x10] sm:$0xff]  ;;  %v2424_v6 = vshrl.u32 %v392_v38, 7  ;;  %vm1100_vm8 = vcmask 785408   ;;  %vm1478_vm9 = vcmask 1041409  }
 0x19c   : > { %v742_v7 = vrot.slane %v2417_v3, 1  ;;  %v743_v8 = vrot.slane %v2419_v4, 1  ;;  %v744_v9 = vrot.slane %v2421_v5, 1  ;;  %v810_v10 = vrot.slane %v2417_v3, 3  ;;  %v2434_v13 = vld [vmem:[#allocation2 + $0x18] sm:$0xff]  ;;  %v2436_v38 = vld [vmem:[#allocation2 + $0x20] sm:$0xff] }
 0x19d   : > { %vm760_vm3 = vcmp.lt.s32.totalorder %v2424_v6, 7  ;;  %v811_v11 = vrot.slane %v2419_v4, 3  ;;  %v812_v12 = vrot.slane %v2421_v5, 3  ;;  %vm826_vm5 = vcmp.lt.s32.totalorder %v2424_v6, 5  ;;  %v2465_v29 = vld [vmem:[#allocation2 + $0x28] sm:$0xff]  ;;  %v2467_v30 = vld [vmem:[#allocation2 + $0x30] sm:$0xff] }
 0x19e   : > { %v774_v14 = vsel %vm760_vm3, %v743_v8, %v744_v9  ;;  %v775_v15 = vsel %vm760_vm3, %v742_v7, %v743_v8  ;;  %v777_v16 = vrot.slane %v2417_v3, 2  ;;  %v778_v17 = vrot.slane %v2419_v4, 2  ;;  %v2480_v40 = vld [vmem:[#allocation2 + $0x38] sm:$0xff]  ;;  %v2492_v49 = vld [vmem:[#allocation2 + $0x40] sm:$0xff]  ;;  %v2513_v0 = vld [vmem:[#allocation2 + $0x48] sm:$0xff] }
 0x19f   : > { %v1932_v18 = vpack.i.bf16 %v774_v14, %v775_v15  ;;  %v840_v19 = vsel %vm826_vm5, %v811_v11, %v812_v12  ;;  %v841_v20 = vsel %vm826_vm5, %v810_v10, %v811_v11  ;;  %v779_v21 = vrot.slane %v2421_v5, 2  ;;  %v2522_v11 = vld [vmem:[#allocation2 + $0x50] sm:$0xff] }
 0x1a0   : > { %v1942_v22 = vpack.i.bf16 %v840_v19, %v841_v20  ;;  %vm793_vm6 = vcmp.lt.s32.totalorder %v2424_v6, 6  ;;  %v745_v23 = vrot.slane %v2434_v13, 1  ;;  %v746_v24 = vrot.slane %v2436_v38, 1 }
 0x1a1   : > { %1933 = vrot.lane.b32.xlu0 %v1932_v18, %s2168_s30  ;;  %v807_v25 = vsel %vm793_vm6, %v778_v17, %v779_v21  ;;  %v808_v26 = vsel %vm793_vm6, %v777_v16, %v778_v17  ;;  %v780_v27 = vrot.slane %v2434_v13, 2  ;;  %v781_v28 = vrot.slane %v2436_v38, 2 }
 0x1a2   : > { %1943 = vrot.lane.b32.xlu1 %v1942_v22, %s2169_s15  ;;  %v1937_v31 = vpack.i.bf16 %v807_v25, %v808_v26  ;;  %v772_v32 = vsel %vm760_vm3, %v745_v23, %v746_v24  ;;  %v773_v33 = vsel %vm760_vm3, %v744_v9, %v745_v23  ;;  %v813_v34 = vrot.slane %v2434_v13, 3  ;;  %v2540_v25 = vld [vmem:[#allocation2 + $0x60] sm:$0xff] }
 0x1a3   : > { %v1947_v35 = vpack.i.bf16 %v772_v32, %v773_v33  ;;  %v805_v36 = vsel %vm793_vm6, %v780_v27, %v781_v28  ;;  %v806_v37 = vsel %vm793_vm6, %v779_v21, %v780_v27  ;;  %v814_v39 = vrot.slane %v2436_v38, 3 }
 0x1a4   : > { %v1952_v41 = vpack.i.bf16 %v805_v36, %v806_v37  ;;  %v839_v42 = vsel %vm826_vm5, %v812_v12, %v813_v34  ;;  %v747_v43 = vrot.slane %v2465_v29, 1  ;;  %v748_v44 = vrot.slane %v2467_v30, 1 }
 0x1a5   : > { %1938 = vrot.lane.b32.xlu0 %v1937_v31, %s2170_s16  ;;  %v838_v45 = vsel %vm826_vm5, %v813_v34, %v814_v39  ;;  %v782_v46 = vrot.slane %v2465_v29, 2  ;;  %v783_v47 = vrot.slane %v2467_v30, 2  ;;  %v815_v48 = vrot.slane %v2465_v29, 3 }
 0x1a6   : > { %1948 = vrot.lane.b32.xlu1 %v1947_v35, %s2168_s30  ;;  %v1957_v50 = vpack.i.bf16 %v838_v45, %v839_v42  ;;  %v770_v51 = vsel %vm760_vm3, %v747_v43, %v748_v44  ;;  %v771_v52 = vsel %vm760_vm3, %v746_v24, %v747_v43  ;;  %v816_v53 = vrot.slane %v2467_v30, 3  ;;  %v2538_v24 = vld [vmem:[#allocation2 + $0x58] sm:$0xff] }
 0x1a7   : > { %v803_v54 = vsel %vm793_vm6, %v782_v46, %v783_v47  ;;  %v804_v55 = vsel %vm793_vm6, %v781_v28, %v782_v46  ;;  %v1962_v56 = vpack.i.bf16 %v770_v51, %v771_v52  ;;  %v837_v57 = vsel %vm826_vm5, %v814_v39, %v815_v48  ;;  %v2556_v39 = vld [vmem:[#allocation2 + $0x68] sm:$0xff] }
 0x1a8   : > { %v749_v58 = vrot.slane %v2480_v40, 1  ;;  %v750_v59 = vrot.slane %v2492_v49, 1  ;;  %v1967_v60 = vpack.i.bf16 %v803_v54, %v804_v55  ;;  %v836_v61 = vsel %vm826_vm5, %v815_v48, %v816_v53  ;;  %v2053_v55 = vld [vmem:[%s2955_s3 + $0x38] sm:$0xff]  }
 0x1a9   : > { %1953 = vrot.lane.b32.xlu0 %v1952_v41, %s2170_s16  ;;  %v784_v62 = vrot.slane %v2480_v40, 2  ;;  %v785_v63 = vrot.slane %v2492_v49, 2  ;;  %v817_v8 = vrot.slane %v2480_v40, 3  ;;  %v818_v9 = vrot.slane %v2492_v49, 3  ;;  %v2558_v41 = vld [vmem:[#allocation2 + $0x70] sm:$0xff] }
 0x1aa   : > { %1958 = vrot.lane.b32.xlu1 %v1957_v50, %s2169_s15  ;;  %v768_v1 = vsel %vm760_vm3, %v749_v58, %v750_v59  ;;  %v769_v2 = vsel %vm760_vm3, %v748_v44, %v749_v58  ;;  %v1972_v12 = vpack.i.bf16 %v836_v61, %v837_v57  ;;  %v751_v14 = vrot.slane %v2513_v0, 1 }
 0x1ab   : > { %v1977_v15 = vpack.i.bf16 %v768_v1, %v769_v2  ;;  %v801_v17 = vsel %vm793_vm6, %v784_v62, %v785_v63  ;;  %v802_v18 = vsel %vm793_vm6, %v783_v47, %v784_v62  ;;  %v752_v19 = vrot.slane %v2522_v11, 1 }
 0x1ac   : > { %v834_v20 = vsel %vm826_vm5, %v817_v8, %v818_v9  ;;  %v835_v21 = vsel %vm826_vm5, %v816_v53, %v817_v8  ;;  %v786_v22 = vrot.slane %v2513_v0, 2  ;;  %v787_v23 = vrot.slane %v2522_v11, 2 }
 0x1ad   : > { %1963 = vrot.lane.b32.xlu0 %v1962_v56, %s2168_s30  ;;  %v1982_v26 = vpack.i.bf16 %v801_v17, %v802_v18  ;;  %v767_v27 = vsel %vm760_vm3, %v750_v59, %v751_v14  ;;  %v1987_v28 = vpack.i.bf16 %v834_v20, %v835_v21  ;;  %v766_v31 = vsel %vm760_vm3, %v751_v14, %v752_v19  ;;  %v2602_v17 = vld [vmem:[#allocation2 + $0x78] sm:$0xff] }
 0x1ae   : > { %1968 = vrot.lane.b32.xlu1 %v1967_v60, %s2170_s16  ;;  %v819_v32 = vrot.slane %v2513_v0, 3  ;;  %v820_v33 = vrot.slane %v2522_v11, 3  ;;  %v799_v34 = vsel %vm793_vm6, %v786_v22, %v787_v23  ;;  %v800_v35 = vsel %vm793_vm6, %v785_v63, %v786_v22 }
 0x1af   : > { %v753_v36 = vrot.slane %v2538_v24, 1  ;;  %v754_v37 = vrot.slane %v2540_v25, 1  ;;  %v788_v42 = vrot.slane %v2538_v24, 2  ;;  %v789_v43 = vrot.slane %v2540_v25, 2 }
 0x1b0   : > { %v1992_v44 = vpack.i.bf16 %v766_v31, %v767_v27  ;;  %v1997_v45 = vpack.i.bf16 %v799_v34, %v800_v35  ;;  %v833_v46 = vsel %vm826_vm5, %v818_v9, %v819_v32  ;;  %v832_v47 = vsel %vm826_vm5, %v819_v32, %v820_v33 }
 0x1b1   : > { %1973 = vrot.lane.b32.xlu0 %v1972_v12, %s2169_s15  ;;  %v764_v48 = vsel %vm760_vm3, %v753_v36, %v754_v37  ;;  %v821_v50 = vrot.slane %v2538_v24, 3  ;;  %v822_v51 = vrot.slane %v2540_v25, 3  ;;  %v765_v52 = vsel %vm760_vm3, %v752_v19, %v753_v36  ;;  %v2054_v12 = vld [vmem:[%s2955_s3 + $0x30] sm:$0xff]   ;;  %v2055_v36 = vld [vmem:[%s2955_s3 + $0x28] sm:$0xff]  }
 0x1b2   : > { %1978 = vrot.lane.b32.xlu1 %v1977_v15, %s2168_s30  ;;  %v755_v53 = vrot.slane %v2556_v39, 1  ;;  %v756_v54 = vrot.slane %v2558_v41, 1  ;;  %v797_v56 = vsel %vm793_vm6, %v788_v42, %v789_v43  ;;  %v798_v57 = vsel %vm793_vm6, %v787_v23, %v788_v42 }
 0x1b3   : > { %v2171_v58 = vmov 0   ;;  %v843_v59 = vrot.slane %v2417_v3, 4  ;;  %v844_v60 = vrot.slane %v2419_v4, 4  ;;  %v2002_v61 = vpack.i.bf16 %v832_v47, %v833_v46 }
 0x1b4   : > { %1244 = vmatprep.subr.bf16.mxu0 %v2171_v58  ;;  %2052 = vset.pattern.permute.xlu0 %v2171_v58  ;;  %v2007_v62 = vpack.i.bf16 %v764_v48, %v765_v52  ;;  %v830_v63 = vsel %vm826_vm5, %v821_v50, %v822_v51  ;;  %v831_v1 = vsel %vm826_vm5, %v820_v33, %v821_v50  ;;  %v790_v2 = vrot.slane %v2556_v39, 2  ;;  %v2056_v52 = vld [vmem:[%s2955_s3 + $0x20] sm:$0xff]  }
 0x1b5   : > { %1983 = vrot.lane.b32.xlu0 %v1982_v26, %s2170_s16  ;;  %v2012_v8 = vpack.i.bf16 %v797_v56, %v798_v57  ;;  %v791_v9 = vrot.slane %v2558_v41, 2  ;;  %1245 = vmatpush1.bf16.msra.mxu0 %v2053_v55  ;;  %v845_v14 = vrot.slane %v2421_v5, 4  ;;  %vm859_vm7 = vcmp.lt.s32.totalorder %v2424_v6, 4  ;;  %v2057_v57 = vld [vmem:[%s2955_s3 + $0x18] sm:$0xff]  }
 0x1b6   : > { %1988 = vrot.lane.b32.xlu1 %v1987_v28, %s2169_s15  ;;  %v762_v15 = vsel %vm760_vm3, %v755_v53, %v756_v54  ;;  %1246 = vmatprep.subr.bf16.mxu0 %v2171_v58  ;;  %v874_v18 = vsel %vm859_vm7, %v843_v59, %v844_v60  ;;  %v846_v19 = vrot.slane %v2434_v13, 4  ;;  %v847_v20 = vrot.slane %v2436_v38, 4 }
 0x1b7   : > { %v2017_v21 = vpack.i.bf16 %v830_v63, %v831_v1  ;;  %v763_v22 = vsel %vm760_vm3, %v754_v37, %v755_v53  ;;  %v823_v23 = vrot.slane %v2556_v39, 3  ;;  %v873_v26 = vsel %vm859_vm7, %v844_v60, %v845_v14  ;;  %v2059_v63 = vld [vmem:[%s2955_s3 + $0x8] sm:$0xff]  }
 0x1b8   : > { %v824_v27 = vrot.slane %v2558_v41, 3  ;;  %v1118_v28 = vpack.c.bf16 %v873_v26, %v874_v18  ;;  %v2623_v31 = vsel %vm859_vm7, %v846_v19, %v847_v20  ;;  %v2627_v32 = vsel %vm859_vm7, %v845_v14, %v846_v19 }
 0x1b9   : > { %1993 = vrot.lane.b32.xlu0 %v1992_v44, %s2168_s30  ;;  %v795_v33 = vsel %vm793_vm6, %v790_v2, %v791_v9  ;;  %v796_v34 = vsel %vm793_vm6, %v789_v43, %v790_v2  ;;  %v757_v35 = vrot.slane %v2602_v17, 1  ;;  %1247 = vmatpush1.bf16.msra.mxu0 %v2054_v12  ;;  %v1120_v37 = vpack.c.bf16 %v2623_v31, %v2627_v32  ;;  %v2061_v12 = vld [vmem:[%s2955_s3 + $0x48] sm:$0xff]  }
 0x1ba   : > { %1998 = vrot.lane.b32.xlu1 %v1997_v45, %s2170_s16  ;;  %1248 = vmatprep.subr.bf16.mxu0 %v2171_v58  ;;  %v2022_v42 = vpack.i.bf16 %v762_v15, %v763_v22  ;;  %v2027_v43 = vpack.i.bf16 %v795_v33, %v796_v34  ;;  %v828_v44 = vsel %vm826_vm5, %v823_v23, %v824_v27  ;;  %v792_v46 = vrot.slane %v2602_v17, 2 }
 0x1bb   : > { %1752 = vmatprep.mubr.msk.bf16.mxu0 %vm705_vm2, %v1118_v28  ;;  %v829_v45 = vsel %vm826_vm5, %v822_v51, %v823_v23  ;;  %v761_v47 = vsel %vm760_vm3, %v756_v54, %v757_v35  ;;  %v776_v48 = vsel %vm760_vm3, %v757_v35, %v742_v7  ;;  %v825_v50 = vrot.slane %v2602_v17, 3 }
 0x1bc   : > { %v2032_v51 = vpack.i.bf16 %v828_v44, %v829_v45  ;;  %v2037_v53 = vpack.i.bf16 %v776_v48, %v761_v47  ;;  %v794_v54 = vsel %vm793_vm6, %v791_v9, %v792_v46  ;;  %v809_v7 = vsel %vm793_vm6, %v792_v46, %v777_v16  ;;  %v2060_v9 = vld [vmem:[%s2955_s3] sm:$0xff]  }
 0x1bd   : > { %2003 = vrot.lane.b32.xlu0 %v2002_v61, %s2169_s15  ;;  %1249 = vmatpush1.bf16.msra.mxu0 %v2055_v36  ;;  %v827_v55 = vsel %vm826_vm5, %v824_v27, %v825_v50  ;;  %v842_v56 = vsel %vm826_vm5, %v825_v50, %v810_v10  ;;  %v2042_v60 = vpack.i.bf16 %v809_v7, %v794_v54  ;;  %v2058_v61 = vld [vmem:[%s2955_s3 + $0x10] sm:$0xff]   ;;  %v857_v10 = vrot.slane %v2558_v41, 4 }
 0x1be   : > { %2008 = vrot.lane.b32.xlu1 %v2007_v62, %s2168_s30  ;;  %1250 = vmatprep.subr.bf16.mxu0 %v2171_v58  ;;  %v2047_v16 = vpack.i.bf16 %v842_v56, %v827_v55  ;;  %v858_v62 = vrot.slane %v2602_v17, 4  ;;  %vm1480_vm10 = vcmask 1042434   ;;  %vm1482_vm11 = vcmask 1043459  }
 0x1bf   : > { %vm1484_vm12 = vcmask 1044484   ;;  %vm1486_vm13 = vcmask 1045509   ;;  %vm1488_vm14 = vcmask 1046534   ;;  %vm1490_vm15 = vcmask 1047559  }
 0x1c0   : > { %v2695_v1 = vsel %vm859_vm7, %v857_v10, %v858_v62  ;;  %v2701_v2 = vsel %vm859_vm7, %v858_v62, %v843_v59  ;;  %v2062_v59 = vld [vmem:[%s2955_s3 + $0x40] sm:$0xff]  }
 0x1c1   : > { %2013 = vrot.lane.b32.xlu0 %v2012_v8, %s2170_s16  ;;  %1251 = vmatpush1.bf16.msra.mxu0 %v2056_v52  ;;  %v1132_v8 = vpack.c.bf16 %v2701_v2, %v2695_v1  ;;  %v2064_v1 = vld [vmem:[%s2958_s6 + $0x30] sm:$0xff]   ;;  %v2065_v2 = vld [vmem:[%s2958_s6 + $0x28] sm:$0xff]  }
 0x1c2   : > { %2018 = vrot.lane.b32.xlu1 %v2017_v21, %s2169_s15  ;;  %1252 = vmatprep.subr.bf16.mxu0 %v2171_v58 }
 0x1c5   : > { %2023 = vrot.lane.b32.xlu0 %v2022_v42, %s2168_s30  ;;  %1253 = vmatpush1.bf16.msra.mxu0 %v2057_v57 }
 0x1c6   : > { %2028 = vrot.lane.b32.xlu1 %v2027_v43, %s2170_s16  ;;  %1254 = vmatprep.subr.bf16.mxu0 %v2171_v58  ;;  %v848_v43 = vrot.slane %v2465_v29, 4 }
 0x1c9   : > { %2033 = vrot.lane.b32.xlu0 %v2032_v51, %s2169_s15  ;;  %1255 = vmatpush1.bf16.msra.mxu0 %v2058_v61  ;;  %v849_v51 = vrot.slane %v2467_v30, 4 }
 0x1ca   : > { %2038 = vrot.lane.b32.xlu1 %v2037_v53, %s2168_s30  ;;  %1256 = vmatprep.subr.bf16.mxu0 %v2171_v58 }
 0x1cd   : > { %2043 = vrot.lane.b32.xlu0 %v2042_v60, %s2170_s16  ;;  %1257 = vmatpush1.bf16.msra.mxu0 %v2059_v63  ;;  %v869_v60 = vsel %vm859_vm7, %v848_v43, %v849_v51 }
 0x1ce   : > { %2048 = vrot.lane.b32.xlu1 %v2047_v16, %s2169_s15  ;;  %1258 = vmatprep.subr.bf16.mxu0 %v2171_v58  ;;  %v870_v16 = vsel %vm859_vm7, %v847_v20, %v848_v43  ;;  %v851_v20 = vrot.slane %v2492_v49, 4 }
 0x1d1   : > { %1259 = vmatpush1.bf16.msra.mxu0 %v2060_v9 }
 0x1d2   : > { %1272 = vmatprep.subr.bf16.mxu0 %v2171_v58 }
 0x1d5   : > { %1273 = vmatpush2.bf16.msra.mxu0 %v2061_v12  ;;  %v1122_v12 = vpack.c.bf16 %v869_v60, %v870_v16 }
 0x1d6   : > { %1274 = vmatprep.subr.bf16.mxu0 %v2171_v58 }
 0x1d9   : > { %1275 = vmatpush2.bf16.msra.mxu0 %v2062_v59 }
 0x213   : > { %v1934_v14 = vpop.permute.xlu0 %1933 }
 0x214   : > { %v1944_v15 = vpop.permute.xlu1 %1943  ;;  %v1936_v18 = vunpack.i.h.bf16 %v1934_v14  ;;  %v1935_v19 = vunpack.i.l.bf16 %v1934_v14 }
 0x215   : > { %v1946_v21 = vunpack.i.h.bf16 %v1944_v15  ;;  %v1945_v22 = vunpack.i.l.bf16 %v1944_v15  ;;  %v850_v15 = vrot.slane %v2480_v40, 4 }
 0x216   : > { %v1069_v33 = vsel %vm705_vm2, %v2419_v4, %v1936_v18  ;;  %v1068_v34 = vsel %vm705_vm2, %v2417_v3, %v1935_v19 }
 0x217   : > { %v1939_v23 = vpop.permute.xlu0 %1938 }
 0x218   : > { %v1941_v26 = vunpack.i.h.bf16 %v1939_v23  ;;  %v1940_v27 = vunpack.i.l.bf16 %v1939_v23  ;;  %v1949_v28 = vpop.permute.xlu1 %1948 }
 0x219   : > { %v1951_v35 = vunpack.i.h.bf16 %v1949_v28  ;;  %v1950_v58 = vunpack.i.l.bf16 %v1949_v28 }
 0x21a   : > { %v1084_v36 = vsel %vm530_vm4, %v1068_v34, %v1940_v27  ;;  %v1085_v42 = vsel %vm530_vm4, %v1069_v33, %v1941_v26  ;;  %v868_v27 = vsel %vm859_vm7, %v849_v51, %v850_v15 }
 0x21b   : > { %v1071_v44 = vsel %vm705_vm2, %v2434_v13, %v1951_v35  ;;  %v1070_v45 = vsel %vm705_vm2, %v2421_v5, %v1950_v58  ;;  %v1954_v46 = vpop.permute.xlu0 %1953  ;;  %v1101_v4 = vsel %vm1100_vm8, %v1084_v36, %v1945_v22  ;;  %v1102_v47 = vsel %vm1100_vm8, %v1085_v42, %v1946_v21 }
 0x21c   : > { %v1956_v3 = vunpack.i.h.bf16 %v1954_v46  ;;  %v1955_v48 = vunpack.i.l.bf16 %v1954_v46  ;;  %v1959_v50 = vpop.permute.xlu1 %1958  ;;  %v1117_v52 = vpack.c.bf16 %v1102_v47, %v1101_v4  ;;  %v852_v46 = vrot.slane %v2513_v0, 4 }
 0x21d   : > { %v1961_v53 = vunpack.i.h.bf16 %v1959_v50  ;;  %v1960_v54 = vunpack.i.l.bf16 %v1959_v50  ;;  %v853_v4 = vrot.slane %v2522_v11, 4 }
 0x21e   : > { %v1087_v7 = vsel %vm530_vm4, %v1071_v44, %v1956_v3  ;;  %v1086_v13 = vsel %vm530_vm4, %v1070_v45, %v1955_v48  ;;  %1277 = vmatmul.mubr.bf16.vlgmr.msra.gmra.mxu0 %v1117_v52 }
 0x21f   : > { %v1964_v55 = vpop.permute.xlu0 %1963  ;;  %1753 = vmatprep.mubr.msk.bf16.mxu0 %vm705_vm2, %v1120_v37  ;;  %v1103_v61 = vsel %vm1100_vm8, %v1086_v13, %v1960_v54  ;;  %v1104_v62 = vsel %vm1100_vm8, %v1087_v7, %v1961_v53  ;;  %v866_v53 = vsel %vm859_vm7, %v851_v20, %v852_v46 }
 0x220   : > { %v1966_v5 = vunpack.i.h.bf16 %v1964_v55  ;;  %v1965_v56 = vunpack.i.l.bf16 %v1964_v55  ;;  %v1969_v57 = vpop.permute.xlu1 %1968  ;;  %v1119_v59 = vpack.c.bf16 %v1104_v62, %v1103_v61  ;;  %v854_v62 = vrot.slane %v2538_v24, 4 }
 0x221   : > { %v1971_v63 = vunpack.i.h.bf16 %v1969_v57  ;;  %v1970_v9 = vunpack.i.l.bf16 %v1969_v57 }
 0x222   : > { %v1073_v31 = vsel %vm705_vm2, %v2465_v29, %v1966_v5  ;;  %v1072_v32 = vsel %vm705_vm2, %v2436_v38, %v1965_v56  ;;  %v867_v38 = vsel %vm859_vm7, %v850_v15, %v851_v20 }
 0x223   : > { %v1974_v37 = vpop.permute.xlu0 %1973  ;;  %v1088_v21 = vsel %vm530_vm4, %v1072_v32, %v1970_v9  ;;  %v1089_v22 = vsel %vm530_vm4, %v1073_v31, %v1971_v63  ;;  %v1124_v43 = vpack.c.bf16 %v867_v38, %v868_v27  ;;  %v855_v63 = vrot.slane %v2540_v25, 4 }
 0x224   : > { %v1979_v14 = vpop.permute.xlu1 %1978  ;;  %v1976_v18 = vunpack.i.h.bf16 %v1974_v37  ;;  %v1975_v19 = vunpack.i.l.bf16 %v1974_v37  ;;  %v856_v27 = vrot.slane %v2556_v39, 4 }
 0x225   : > { %v1981_v23 = vunpack.i.h.bf16 %v1979_v14  ;;  %v1980_v29 = vunpack.i.l.bf16 %v1979_v14  ;;  %v864_v14 = vsel %vm859_vm7, %v853_v4, %v854_v62 }
 0x226   : > { %1285 = vmatmul.mubr.bf16.gmra.mxu0 %v1119_v59  ;;  %v1105_v28 = vsel %vm1100_vm8, %v1088_v21, %v1975_v19  ;;  %v1106_v33 = vsel %vm1100_vm8, %v1089_v22, %v1976_v18 }
 0x227   : > { %v1984_v26 = vpop.permute.xlu0 %1983  ;;  %1754 = vmatprep.mubr.msk.bf16.mxu0 %vm705_vm2, %v1122_v12  ;;  %v1075_v36 = vsel %vm705_vm2, %v2480_v40, %v1981_v23  ;;  %v1074_v42 = vsel %vm705_vm2, %v2467_v30, %v1980_v29  ;;  %v1121_v44 = vpack.c.bf16 %v1106_v33, %v1105_v28  ;;  %v865_v30 = vsel %vm859_vm7, %v852_v46, %v853_v4 }
 0x228   : > { %v1986_v34 = vunpack.i.h.bf16 %v1984_v26  ;;  %v1985_v35 = vunpack.i.l.bf16 %v1984_v26  ;;  %v1989_v58 = vpop.permute.xlu1 %1988  ;;  %v1126_v60 = vpack.c.bf16 %v865_v30, %v866_v53 }
 0x229   : > { %v1991_v47 = vunpack.i.h.bf16 %v1989_v58  ;;  %v1990_v3 = vunpack.i.l.bf16 %v1989_v58 }
 0x22a   : > { %v1091_v48 = vsel %vm530_vm4, %v1075_v36, %v1986_v34  ;;  %v1090_v50 = vsel %vm530_vm4, %v1074_v42, %v1985_v35 }
 0x22b   : > { %v1994_v45 = vpop.permute.xlu0 %1993  ;;  %v1107_v54 = vsel %vm1100_vm8, %v1090_v50, %v1990_v3  ;;  %v1108_v7 = vsel %vm1100_vm8, %v1091_v48, %v1991_v47 }
 0x22c   : > { %v1999_v52 = vpop.permute.xlu1 %1998  ;;  %v1996_v51 = vunpack.i.h.bf16 %v1994_v45  ;;  %v1995_v40 = vunpack.i.l.bf16 %v1994_v45  ;;  %v1123_v16 = vpack.c.bf16 %v1108_v7, %v1107_v54 }
 0x22d   : > { %v2001_v13 = vunpack.i.h.bf16 %v1999_v52  ;;  %v2000_v55 = vunpack.i.l.bf16 %v1999_v52 }
 0x22e   : > { %1293 = vmatmul.mubr.bf16.gmra.mxu0 %v1121_v44  ;;  %v1077_v56 = vsel %vm705_vm2, %v2513_v0, %v1996_v51  ;;  %v1076_v57 = vsel %vm705_vm2, %v2492_v49, %v1995_v40  ;;  %v863_v49 = vsel %vm859_vm7, %v854_v62, %v855_v63 }
 0x22f   : > { %1755 = vmatprep.mubr.msk.bf16.mxu0 %vm705_vm2, %v1124_v43  ;;  %v2004_v5 = vpop.permute.xlu0 %2003  ;;  %v1092_v32 = vsel %vm530_vm4, %v1076_v57, %v2000_v55  ;;  %v1093_v37 = vsel %vm530_vm4, %v1077_v56, %v2001_v13  ;;  %v1128_v29 = vpack.c.bf16 %v863_v49, %v864_v14 }
 0x230   : > { %v2009_v61 = vpop.permute.xlu1 %2008  ;;  %v2006_v9 = vunpack.i.h.bf16 %v2004_v5  ;;  %v2005_v31 = vunpack.i.l.bf16 %v2004_v5 }
 0x231   : > { %v2011_v59 = vunpack.i.h.bf16 %v2009_v61  ;;  %v2010_v0 = vunpack.i.l.bf16 %v2009_v61 }
 0x232   : > { %v1109_v15 = vsel %vm1100_vm8, %v1092_v32, %v2005_v31  ;;  %v1110_v20 = vsel %vm1100_vm8, %v1093_v37, %v2006_v9  ;;  %v2172_v31 = vmov 0.0   ;;  %v2067_v32 = vld [vmem:[%s2958_s6 + $0x18] sm:$0xff]   ;;  %v2068_v37 = vld [vmem:[%s2958_s6 + $0x10] sm:$0xff]  }
 0x233   : > { %v2014_v12 = vpop.permute.xlu0 %2013  ;;  %v1079_v22 = vsel %vm705_vm2, %v2538_v24, %v2011_v59  ;;  %v1078_v23 = vsel %vm705_vm2, %v2522_v11, %v2010_v0  ;;  %v1125_v26 = vpack.c.bf16 %v1110_v20, %v1109_v15  ;;  %v861_v11 = vsel %vm859_vm7, %v856_v27, %v857_v10  ;;  %1818 = vmatprep.subr.bf16.mxu1 %v2172_v31  ;;  %v2070_v59 = vld [vmem:[%s2958_s6] sm:$0xff]  }
 0x234   : > { %v2016_v18 = vunpack.i.h.bf16 %v2014_v12  ;;  %v2015_v19 = vunpack.i.l.bf16 %v2014_v12  ;;  %v2019_v21 = vpop.permute.xlu1 %2018  ;;  %v862_v24 = vsel %vm859_vm7, %v855_v63, %v856_v27  ;;  %v2069_v12 = vld [vmem:[%s2958_s6 + $0x8] sm:$0xff]   ;;  %v1583_v0 = vld [vmem:[%s2317_s14] sm:$0xff] }
 0x235   : > { %v2021_v28 = vunpack.i.h.bf16 %v2019_v21  ;;  %v2020_v33 = vunpack.i.l.bf16 %v2019_v21  ;;  %v1130_v48 = vpack.c.bf16 %v861_v11, %v862_v24  ;;  %1586 = vperm.xlu0 %2052, %v1583_v0  }
 0x236   : > { %1301 = vmatmul.mubr.bf16.gmra.mxu0 %v1123_v16  ;;  %v1095_v34 = vsel %vm530_vm4, %v1079_v22, %v2016_v18  ;;  %v1094_v35 = vsel %vm530_vm4, %v1078_v23, %v2015_v19 }
 0x237   : > { %1756 = vmatprep.mubr.msk.bf16.mxu0 %vm705_vm2, %v1126_v60  ;;  %v2024_v38 = vpop.permute.xlu0 %2023  ;;  %v1111_v43 = vsel %vm1100_vm8, %v1094_v35, %v2020_v33  ;;  %v1112_v44 = vsel %vm1100_vm8, %v1095_v34, %v2021_v28  ;;  %v2855_v34 = vld [vmem:[%s2956_s4] ss:$0 sm:$0xff] }
 0x238   : > { %v2029_v58 = vpop.permute.xlu1 %2028  ;;  %v2026_v36 = vunpack.i.h.bf16 %v2024_v38  ;;  %v2025_v42 = vunpack.i.l.bf16 %v2024_v38  ;;  %v1127_v50 = vpack.c.bf16 %v1112_v44, %v1111_v43 }
 0x239   : > { %v2031_v45 = vunpack.i.h.bf16 %v2029_v58  ;;  %v2030_v46 = vunpack.i.l.bf16 %v2029_v58 }
 0x23a   : > { %v1081_v47 = vsel %vm705_vm2, %v2556_v39, %v2026_v36  ;;  %v1080_v3 = vsel %vm705_vm2, %v2540_v25, %v2025_v42 }
 0x23b   : > { %v2034_v4 = vpop.permute.xlu0 %2033  ;;  %v1096_v6 = vsel %vm530_vm4, %v1080_v3, %v2030_v46  ;;  %v1097_v40 = vsel %vm530_vm4, %v1081_v47, %v2031_v45 }
 0x23c   : > { %v2039_v52 = vpop.permute.xlu1 %2038  ;;  %v2036_v10 = vunpack.i.h.bf16 %v2034_v4  ;;  %v2035_v51 = vunpack.i.l.bf16 %v2034_v4 }
 0x23d   : > { %v2041_v30 = vunpack.i.h.bf16 %v2039_v52  ;;  %v2040_v53 = vunpack.i.l.bf16 %v2039_v52 }
 0x23e   : > { %1309 = vmatmul.mubr.bf16.gmra.mxu0 %v1125_v26  ;;  %v1113_v39 = vsel %vm1100_vm8, %v1096_v6, %v2035_v51  ;;  %v1114_v7 = vsel %vm1100_vm8, %v1097_v40, %v2036_v10  ;;  %v2869_v10 = vld [vmem:[%s2957_s5 + $0x8] sm:$0xff] }
 0x23f   : > { %1757 = vmatprep.mubr.msk.bf16.mxu0 %vm705_vm2, %v1128_v29  ;;  %v2044_v54 = vpop.permute.xlu0 %2043  ;;  %v1083_v5 = vsel %vm705_vm2, %v2602_v17, %v2041_v30  ;;  %v1082_v56 = vsel %vm705_vm2, %v2558_v41, %v2040_v53  ;;  %v1129_v57 = vpack.c.bf16 %v1114_v7, %v1113_v39  ;;  %v2063_v41 = vld [vmem:[%s2958_s6 + $0x38] sm:$0xff]   ;;  %v2875_v39 = vld [vmem:[%s2957_s5] sm:$0xff] }
 0x240   : > { %v2046_v25 = vunpack.i.h.bf16 %v2044_v54  ;;  %v2045_v13 = vunpack.i.l.bf16 %v2044_v54  ;;  %v2049_v55 = vpop.permute.xlu1 %2048  ;;  %1819 = vmatpush3.bf16.msra.mxu1 %v2063_v41 }
 0x241   : > { %v2051_v60 = vunpack.i.h.bf16 %v2049_v55  ;;  %v2050_v16 = vunpack.i.l.bf16 %v2049_v55  ;;  %1820 = vmatprep.subr.bf16.mxu1 %v2172_v31 }
 0x242   : > { %v1099_v61 = vsel %vm530_vm4, %v1083_v5, %v2046_v25  ;;  %v1098_v62 = vsel %vm530_vm4, %v1082_v56, %v2045_v13  ;;  %vm2173_vm4 = vmmov 0  }
 0x243   : > { %v1115_v63 = vsel %vm1100_vm8, %v1098_v62, %v2050_v16  ;;  %v1116_v17 = vsel %vm1100_vm8, %v1099_v61, %v2051_v60  ;;  %1834 = vmatprep.mubr.msk.bf16.mxu1 %vm2173_vm4, %v2172_v31 }
 0x244   : > { %v1131_v9 = vpack.c.bf16 %v1116_v17, %v1115_v63  ;;  %1821 = vmatpush3.bf16.msra.mxu1 %v2064_v1 }
 0x245   : > { %1822 = vmatprep.subr.bf16.mxu1 %v2172_v31 }
 0x246   : > { %1317 = vmatmul.mubr.bf16.gmra.mxu0 %v1127_v50 }
 0x247   : > { %1758 = vmatprep.mubr.msk.bf16.mxu0 %vm705_vm2, %v1130_v48 }
 0x248   : > { %1823 = vmatpush3.bf16.msra.mxu1 %v2065_v2 }
 0x249   : > { %1824 = vmatprep.subr.bf16.mxu1 %v2172_v31 }
 0x24e   : > { %1325 = vmatmul.mubr.bf16.gmra.mxu0 %v1129_v57 }
 0x24f   : > { %1759 = vmatprep.mubr.msk.bf16.mxu0 %vm705_vm2, %v1132_v8  ;;  %v2066_v8 = vld [vmem:[%s2958_s6 + $0x20] sm:$0xff]  }
 0x250   : > { %1825 = vmatpush3.bf16.msra.mxu1 %v2066_v8 }
 0x251   : > { %1826 = vmatprep.subr.bf16.mxu1 %v2172_v31 }
 0x254   : > { %1827 = vmatpush3.bf16.msra.mxu1 %v2067_v32 }
 0x255   : > { %1828 = vmatprep.subr.bf16.mxu1 %v2172_v31 }
 0x256   : > { %1333 = vmatmul.mubr.bf16.gmra.mxu0 %v1131_v9 }
 0x258   : > { %1829 = vmatpush3.bf16.msra.mxu1 %v2068_v37 }
 0x259   : > { %1830 = vmatprep.subr.bf16.mxu1 %v2172_v31 }
 0x25c   : > { %1831 = vmatpush3.bf16.msra.mxu1 %v2069_v12 }
 0x25d   : > { %1832 = vmatprep.subr.bf16.mxu1 %v2172_v31 }
 0x260   : > { %1833 = vmatpush3.bf16.msra.mxu1 %v2070_v59 }
 0x2de   : > { %v1278_v49 = vpop.f32.mrf.mxu0 }
 0x2df   : > { %v1279_v44 = vadd.f32 %v2855_v34, %v1278_v49 }
 0x2e0   : > { %v1280_v14 = vpop.f32.mrf.mxu0 }
 0x2e1   : > { %v1341_v40 = vmax.f32 %v1279_v44, 0.0 }
 0x2e2   : > { %v1281_v15 = vpop.f32.mrf.mxu0 }
 0x2e3   : > { %v1282_v36 = vadd.f32 %v2855_v34, %v1281_v15  ;;  %v1359_v62 = vmul.f32 %v2875_v39, %v1341_v40 }
 0x2e4   : > { %v1283_v20 = vpop.f32.mrf.mxu0 }
 0x2e5   : > { %v1342_v3 = vmax.f32 %v1282_v36, 0.0 }
 0x2e6   : > { %v1286_v18 = vpop.f32.mrf.mxu0 }
 0x2e7   : > { %v1287_v24 = vadd.f32 %v2855_v34, %v1286_v18  ;;  %v1360_v13 = vmul.f32 %v2869_v10, %v1342_v3 }
 0x2e8   : > { %v1288_v19 = vpop.f32.mrf.mxu0 }
 0x2e9   : > { %v1343_v51 = vmax.f32 %v1287_v24, 0.0  ;;  %v1375_v1 = vmax.f32 %v1359_v62, %v1360_v13 }
 0x2ea   : > { %v1289_v21 = vpop.f32.mrf.mxu0 }
 0x2eb   : > { %v1290_v58 = vadd.f32 %v2855_v34, %v1289_v21  ;;  %v1361_v60 = vmul.f32 %v2875_v39, %v1343_v51  ;;  %v1376_v20 = vrot.slane %v1375_v1, 4 }
 0x2ec   : > { %v1291_v22 = vpop.f32.mrf.mxu0 }
 0x2ed   : > { %v1344_v4 = vmax.f32 %v1290_v58, 0.0 }
 0x2ee   : > { %v1294_v23 = vpop.f32.mrf.mxu0 }
 0x2ef   : > { %v1295_v45 = vadd.f32 %v2855_v34, %v1294_v23  ;;  %v1362_v7 = vmul.f32 %v2869_v10, %v1344_v4 }
 0x2f0   : > { %v1296_v29 = vpop.f32.mrf.mxu0 }
 0x2f1   : > { %v1345_v30 = vmax.f32 %v1295_v45, 0.0  ;;  %v1382_v41 = vmax.f32 %v1361_v60, %v1362_v7 }
 0x2f2   : > { %v1297_v26 = vpop.f32.mrf.mxu0 }
 0x2f3   : > { %v1298_v42 = vadd.f32 %v2855_v34, %v1297_v26  ;;  %v1363_v63 = vmul.f32 %v2875_v39, %v1345_v30  ;;  %v1383_v14 = vrot.slane %v1382_v41, 4 }
 0x2f4   : > { %v1299_v38 = vpop.f32.mrf.mxu0 }
 0x2f5   : > { %v1346_v48 = vmax.f32 %v1298_v42, 0.0 }
 0x2f6   : > { %v1302_v27 = vpop.f32.mrf.mxu0 }
 0x2f7   : > { %v1303_v47 = vadd.f32 %v2855_v34, %v1302_v27  ;;  %v1364_v55 = vmul.f32 %v2869_v10, %v1346_v48  ;;  %v1384_v27 = vmax.f32 %v1382_v41, %v1383_v14 }
 0x2f8   : > { %v1304_v28 = vpop.f32.mrf.mxu0 }
 0x2f9   : > { %v1347_v25 = vmax.f32 %v1303_v47, 0.0  ;;  %v1389_v2 = vmax.f32 %v1363_v63, %v1364_v55  ;;  %v1385_v45 = vrot.slane %v1384_v27, 2 }
 0x2fa   : > { %v1305_v33 = vpop.f32.mrf.mxu0 }
 0x2fb   : > { %v1306_v43 = vadd.f32 %v2855_v34, %v1305_v33  ;;  %v1365_v31 = vmul.f32 %v2875_v39, %v1347_v25  ;;  %v1390_v18 = vrot.slane %v1389_v2, 4  ;;  %v1377_v33 = vmax.f32 %v1375_v1, %v1376_v20 }
 0x2fc   : > { %v1307_v35 = vpop.f32.mrf.mxu0 }
 0x2fd   : > { %v1348_v6 = vmax.f32 %v1306_v43, 0.0  ;;  %v1391_v35 = vmax.f32 %v1389_v2, %v1390_v18  ;;  %v1378_v47 = vrot.slane %v1377_v33, 2 }
 0x2fe   : > { %v1310_v11 = vpop.f32.mrf.mxu0 }
 0x2ff   : > { %v1311_v50 = vadd.f32 %v2855_v34, %v1310_v11  ;;  %v1366_v16 = vmul.f32 %v2869_v10, %v1348_v6  ;;  %v1392_v3 = vrot.slane %v1391_v35, 2  ;;  %v1379_v25 = vmax.f32 %v1377_v33, %v1378_v47 }
 0x300   : > { %v1312_v46 = vpop.f32.mrf.mxu0 }
 0x301   : > { %v1349_v5 = vmax.f32 %v1311_v50, 0.0  ;;  %v1396_v37 = vmax.f32 %v1365_v31, %v1366_v16  ;;  %v1393_v13 = vmax.f32 %v1391_v35, %v1392_v3  ;;  %v1380_v41 = vrot.slane %v1379_v25, 1 }
 0x302   : > { %v1313_v52 = vpop.f32.mrf.mxu0 }
 0x303   : > { %v1314_v53 = vadd.f32 %v2855_v34, %v1313_v52  ;;  %v1367_v8 = vmul.f32 %v2875_v39, %v1349_v5  ;;  %v1397_v21 = vrot.slane %v1396_v37, 4  ;;  %v1394_v31 = vrot.slane %v1393_v13, 1 }
 0x304   : > { %v1315_v54 = vpop.f32.mrf.mxu0  ;;  %v1381_v14 = vmax.f32 %v1379_v25, %v1380_v41 }
 0x305   : > { %v1350_v56 = vmax.f32 %v1314_v53, 0.0  ;;  %v1398_v36 = vmax.f32 %v1396_v37, %v1397_v21  ;;  %v1386_v53 = vmax.f32 %v1384_v27, %v1385_v45 }
 0x306   : > { %v1318_v57 = vpop.f32.mrf.mxu0 }
 0x307   : > { %v1319_v61 = vadd.f32 %v2855_v34, %v1318_v57  ;;  %v1368_v17 = vmul.f32 %v2869_v10, %v1350_v56  ;;  %v1399_v50 = vrot.slane %v1398_v36, 2  ;;  %v1387_v62 = vrot.slane %v1386_v53, 1 }
 0x308   : > { %v1320_v9 = vpop.f32.mrf.mxu0 }
 0x309   : > { %v1351_v12 = vmax.f32 %v1319_v61, 0.0  ;;  %v1403_v0 = vmax.f32 %v1367_v8, %v1368_v17  ;;  %v1400_v5 = vmax.f32 %v1398_v36, %v1399_v50 }
 0x30a   : > { %v1321_v32 = vpop.f32.mrf.mxu0 }
 0x30b   : > { %v1322_v59 = vadd.f32 %v2855_v34, %v1321_v32  ;;  %v1369_v22 = vmul.f32 %v2875_v39, %v1351_v12  ;;  %v1404_v26 = vrot.slane %v1403_v0, 4  ;;  %v1401_v1 = vrot.slane %v1400_v5, 1 }
 0x30c   : > { %v1323_v49 = vpop.f32.mrf.mxu0  ;;  %v1388_v12 = vmax.f32 %v1386_v53, %v1387_v62  ;;  %v1760_v53 = vld [vmem:[%s2959_s7] ss:$0 sm:$0xff] }
 0x30d   : > { %v1352_v15 = vmax.f32 %v1322_v59, 0.0  ;;  %v1405_v43 = vmax.f32 %v1403_v0, %v1404_v26 }
 0x30e   : > { %v1326_v19 = vpop.f32.mrf.mxu0  ;;  %v1432_v21 = vpack.c.bf16 %v1388_v12, %v1388_v12 }
 0x30f   : > { %v1370_v23 = vmul.f32 %v2869_v10, %v1352_v15  ;;  %v1327_v29 = vadd.f32 %v2855_v34, %v1326_v19  ;;  %v1406_v40 = vrot.slane %v1405_v43, 2  ;;  %v1402_v15 = vmax.f32 %v1400_v5, %v1401_v1 }
 0x310   : > { %v1328_v38 = vpop.f32.mrf.mxu0 }
 0x311   : > { %v1410_v28 = vmax.f32 %v1369_v22, %v1370_v23  ;;  %v1353_v11 = vmax.f32 %v1327_v29, 0.0  ;;  %v1407_v16 = vmax.f32 %v1405_v43, %v1406_v40  ;;  %v1431_v38 = vpack.c.bf16 %v1381_v14, %v1381_v14 }
 0x312   : > { %v1329_v58 = vpop.f32.mrf.mxu0 }
 0x313   : > { %v1411_v42 = vrot.slane %v1410_v28, 4  ;;  %v1330_v24 = vadd.f32 %v2855_v34, %v1329_v58  ;;  %v1371_v52 = vmul.f32 %v2875_v39, %v1353_v11  ;;  %v1408_v37 = vrot.slane %v1407_v16, 1 }
 0x314   : > { %v1331_v44 = vpop.f32.mrf.mxu0 }
 0x315   : > { %v1412_v46 = vmax.f32 %v1410_v28, %v1411_v42  ;;  %v1354_v4 = vmax.f32 %v1330_v24, 0.0  ;;  %v1409_v19 = vmax.f32 %v1407_v16, %v1408_v37  ;;  %v1471_v28 = vunpack.c.l.b16 %v1432_v21 }
 0x316   : > { %v1334_v48 = vpop.f32.mrf.mxu0  ;;  %v1470_v42 = vunpack.c.l.b16 %v1431_v38 }
 0x317   : > { %v1372_v51 = vmul.f32 %v2869_v10, %v1354_v4  ;;  %v1335_v6 = vadd.f32 %v2855_v34, %v1334_v48  ;;  %v1413_v54 = vrot.slane %v1412_v46, 2 }
 0x318   : > { %v1336_v30 = vpop.f32.mrf.mxu0  ;;  %v1479_v44 = vsel %vm1478_vm9, %v1471_v28, %v1470_v42 }
 0x319   : > { %v1417_v7 = vmax.f32 %v1371_v52, %v1372_v51  ;;  %v1355_v57 = vmax.f32 %v1335_v6, 0.0  ;;  %v1414_v63 = vmax.f32 %v1412_v46, %v1413_v54 }
 0x31a   : > { %v1337_v55 = vpop.f32.mrf.mxu0 }
 0x31b   : > { %v1418_v56 = vrot.slane %v1417_v7, 4  ;;  %v1338_v60 = vadd.f32 %v2855_v34, %v1337_v55  ;;  %v1373_v8 = vmul.f32 %v2875_v39, %v1355_v57  ;;  %v1415_v59 = vrot.slane %v1414_v63, 1 }
 0x31c   : > { %v1339_v61 = vpop.f32.mrf.mxu0  ;;  %v1395_v34 = vmax.f32 %v1393_v13, %v1394_v31  ;;  %v1434_v39 = vpack.c.bf16 %v1402_v15, %v1402_v15  ;;  %v1587_v13 = vpop.permute.xlu0 %1586 }
 0x31d   : > { %v1419_v17 = vmax.f32 %v1417_v7, %v1418_v56  ;;  %v1356_v9 = vmax.f32 %v1338_v60, 0.0  ;;  %v1416_v22 = vmax.f32 %v1414_v63, %v1415_v59 }
 0x31e   : > { %v1433_v29 = vpack.c.bf16 %v1395_v34, %v1395_v34  ;;  %v1473_v11 = vunpack.c.l.b16 %v1434_v39 }
 0x31f   : > { %v1420_v2 = vrot.slane %v1419_v17, 2  ;;  %v1374_v32 = vmul.f32 %v2869_v10, %v1356_v9  ;;  %v1435_v10 = vpack.c.bf16 %v1409_v19, %v1409_v19  ;;  %v1436_v33 = vpack.c.bf16 %v1416_v22, %v1416_v22 }
 0x320   : > { %v1472_v58 = vunpack.c.l.b16 %v1433_v29 }
 0x321   : > { %v1421_v0 = vmax.f32 %v1419_v17, %v1420_v2  ;;  %v1424_v49 = vmax.f32 %v1373_v8, %v1374_v32  ;;  %v1474_v43 = vunpack.c.l.b16 %v1435_v10  ;;  %v1475_v45 = vunpack.c.l.b16 %v1436_v33 }
 0x322   : > { %v1481_v47 = vsel %vm1480_vm10, %v1472_v58, %v1479_v44 }
 0x323   : > { %v1422_v20 = vrot.slane %v1421_v0, 1  ;;  %v1425_v18 = vrot.slane %v1424_v49, 4  ;;  %v1483_v48 = vsel %vm1482_vm11, %v1473_v11, %v1481_v47 }
 0x324   : > { %v1485_v50 = vsel %vm1484_vm12, %v1474_v43, %v1483_v48 }
 0x325   : > { %v1426_v23 = vmax.f32 %v1424_v49, %v1425_v18  ;;  %v1423_v26 = vmax.f32 %v1421_v0, %v1422_v20  ;;  %v1487_v51 = vsel %vm1486_vm13, %v1475_v45, %v1485_v50 }
 0x327   : > { %v1427_v27 = vrot.slane %v1426_v23, 2  ;;  %v1437_v36 = vpack.c.bf16 %v1423_v26, %v1423_v26 }
 0x329   : > { %v1428_v35 = vmax.f32 %v1426_v23, %v1427_v27  ;;  %v1476_v4 = vunpack.c.l.b16 %v1437_v36 }
 0x32b   : > { %v1429_v24 = vrot.slane %v1428_v35, 1  ;;  %v1489_v6 = vsel %vm1488_vm14, %v1476_v4, %v1487_v51 }
 0x32d   : > { %v1430_v46 = vmax.f32 %v1428_v35, %v1429_v24 }
 0x32f   : > { %v1438_v3 = vpack.c.bf16 %v1430_v46, %v1430_v46 }
 0x331   : > { %v1477_v52 = vunpack.c.l.b16 %v1438_v3 }
 0x333   : > { %v1491_v40 = vsel %vm1490_vm15, %v1477_v52, %v1489_v6 }
 0x334   : > { %v1492_v30 = vpack.c.b16 %v1491_v40, %v1491_v40 }
 0x336   : > { %1835 = vmatmul.mubr.bf16.vlgmr.msra.gmra.mxu1 %v1492_v30 }
 0x3f6   : > { %v1576_v54 = vpop.f32.mrf.mxu1 }
 0x3f7   : > { %v1577_v7 = vadd.f32 %v1760_v53, %v1576_v54 }
 0x3f8   : > { %v1836_v25 = vpop.f32.mrf.mxu1 }
 0x3f9   : > { %v1582_v55 = vmax.f32 %v1577_v7, 0.0 }
 0x3fa   : > { %v1579_v5 = vpop.f32.mrf.mxu1 }
 0x3fb   : > { %v1589_v56 = vmul.f32 %v1587_v13, %v1582_v55 }
 0x3fc   : > { %v1837_v57 = vpop.f32.mrf.mxu1 }
 0x3fd   : > { %1590 = vst [vmem:[%s340_s0] sm:$0xff] %v1589_v56 }
 0x3fe PF: > { %s1770_s19 = sshll.u32 %s2151_s9, 7  ;;  %s1605_s24 = sshll.u32 %s340_s0, 4  ;;  %s1606_s24 = int_to_ptr.vmem [resolvable:$true] %s1605_s24 }
 0x3ff   : > { %s1603_s16 = scalar_lea.hbm %s2960_s8, %s1770_s19  ;;  %s2969_s14 = sand.u32 1, %s2139_s28  }
 0x400   : > { %s1592_s26 = scalar_lea.sflag [#allocation4], %s2969_s14  ;;  %s2071_s20 = scalar_lea.vmem %s1606_s24, 128 }
 0x401   : > { %p2072_p4 = scmp.ne.s32.totalorder %s1606_s24, %s2071_s20  ;;  %s2174_s22 = smov [#allocation3]  }
 0x402   : > { %s2075_s23 = sshll.u32 %s2174_s22, 4  ;;  %s2076_s23 = int_to_ptr.vmem [resolvable:$false] %s2075_s23 }
 0x403   : > { %p2073_p5 = pnand %p2072_p4, %p2269_p3  ;;  %s2077_s13 = scalar_lea.vmem %s2076_s23, 256 }
 0x404   : > { %p2078_p7 = scmp.lt.s32.totalorder %s1606_s24, %s2076_s23  ;;  %p2079_p8 = scmp.lt.s32.totalorder %s2077_s13, %s2071_s20 }
 0x405   : > { %p2074_p6 = pneg %p2073_p5 }
 0x406   : > { %p2080_p10 = por %p2079_p8, %p2078_p7 }
 0x408   : > { %p2081_p11 = pnand %p2080_p10, %p2074_p6 }
 0x40a   : > { %2084 = shalt.err (!%p2081_p11)
}
 0x40b   : > { %s2085_s9 = scalar_lea.hbm %s1603_s16, 128  ;;  %s2089_s19 = scalar_lea.hbm %s2960_s8, 256 }
 0x40c   : > { %p2086_p12 = scmp.ne.s32.totalorder %s1603_s16, %s2085_s9  ;;  %p2090_p1 = scmp.lt.s32.totalorder %s1603_s16, %s2960_s8 }
 0x40d   : > { %p2091_p2 = scmp.lt.s32.totalorder %s2089_s19, %s2085_s9 }
 0x40e   : > { %p2087_p13 = pnand %p2086_p12, %p2269_p3 }
 0x40f   : > { %p2092_p4 = por %p2091_p2, %p2090_p1 }
 0x410   : > { %p2088_p0 = pneg %p2087_p13 }
 0x412   : > { %p2093_p5 = pnand %p2092_p4, %p2088_p0 }
 0x414   : > { %2096 = shalt.err (!%p2093_p5)
}
 0x415   : > { %1846 = dma.vmem_to_hbm [thread:$0]  (%p2269_p3), %s1606_s24, 128, %s1603_s16, %s1592_s26  }
 0x416 PF: > { %p1852_p6 = scmp.ge.s32.totalorder %s2163_s12, 2  ;;  %s1617_s14 = sand.u32 1, %s2135_s27  }
 0x417   : > { %s1618_s20 = scalar_lea.sflag [#allocation4], %s1617_s14 }
 0x418   : > { %p1849_p7 = pnand %p1852_p6, %p2279_p9 }
 0x41a   : > { %p1850_p8 = pneg %p1849_p7 }
 0x41c   : > { %2130 = dma.done.wait (%p1850_p8), %s1618_s20, 128  }
 0x41d   : > { %2132 = vsyncadd (%p1850_p8), %s1618_s20, 4294967168  ;;  %s21_s12 = sadd.s32 1, %s2163_s12   ;;  %s2970_s17 = sld [smem:[#allocation6_spill]] }
 0x41e   : > { %p18_p10 = scmp.ge.s32.totalorder %s21_s12, 6   ;;  %s2971_s16 = sld [smem:[#allocation7_spill]] }
 0x41f   : > { %s2972_s27 = smov %s2139_s28  ;;  %s2973_s28 = smov %s2143_s29 }
 0x420   : > { %s2974_s29 = smov %s2287_s21  ;;  %s2975_s30 = smov %s2155_s10 }
 0x421   : > { %s2976_s9 = smov %s2159_s11  ;;  %20 = sbr.rel (!%p18_p10) target bundleno = 7 (0x7), region = 101 }
 0x423   : > { %s2977_s10 = smov %s2970_s17 }
 0x424   : > { %s2978_s11 = smov %s2971_s16 }
 0x426   :  { %1623 = vsyncpa [#allocation4], 1 }
 0x427   :  { %1625 = vsyncpa [#allocation4 + $0x1], 1 }

</bundles_post_ra>
